<compile_context>
chip_gen: v7x
topology: tpu7x:2x2x1
jax: 0.10.0
libtpu: 0.0.40
codegen_flags: <defaults>
</compile_context>

<pallas_src>
import functools

import jax
import jax.numpy as jnp
from jax.experimental import pallas as pl
from jax.experimental.pallas import tpu as pltpu

HIDDEN = 32          # config.hidden_size (small demo value)
HEADS = 4            # config.encoder_attention_heads
HEAD_DIM = HIDDEN // HEADS
FFN_DIM = 64         # config.encoder_ffn_dim
LN_EPS = 1e-5


def _encoder_layer_kernel(hs_ref, pos_ref, mask_ref,
                          wqk_ref, bqk_ref, wv_ref, wo_ref,
                          wfc1_ref, bfc1_ref, wfc2_ref,
                          vecp_ref, alpha_ref, out_ref,
                          *, b_blk, seq, hidden, heads, head_dim,
                          matmul_dtype, approx_recip):
    """Whole encoder layer for `b_blk` batch elements (rows flattened to b_blk*seq)."""
    n = b_blk * seq

    hs = hs_ref[...]                      # (n, H)   residual / value input
    hp = hs + pos_ref[...]                # (n, H)   query/key input (object queries added)

    # Key-padding bias (b_blk, 1, S), broadcast once over the query axis (hoisted out
    # of the head loop; JAX does not CSE broadcast_in_dim).
    mask_bc = jnp.broadcast_to(mask_ref[...], (b_blk, seq, seq))

    vec = vecp_ref[...]                   # (7, H)   packed small parameters
    b_v, b_o, b_fc2 = vec[0:1], vec[1:2], vec[2:3]
    ln1_g, ln1_b = vec[3:4], vec[4:5]
    ln2_g, ln2_b = vec[5:6], vec[6:7]

    def mm(a, b):                         # MXU matmul, f32 accumulation
        return jnp.dot(a.astype(matmul_dtype), b.astype(matmul_dtype),
                       preferred_element_type=jnp.float32)

    # Fused q|k projection (scaling pre-folded into the q half) and v projection.
    qk = mm(hp, wqk_ref[...]) + bqk_ref[...]            # (n, 2H)
    v = mm(hs, wv_ref[...]) + b_v                       # (n, H)

    # Multi-head attention; out_proj folded into a per-head accumulation.
    wo = wo_ref[...]                                    # (H, H)
    attn = jnp.zeros((n, hidden), jnp.float32)
    for h in range(heads):                              # static, HEADS iterations
        lo, hi = h * head_dim, (h + 1) * head_dim
        qh = qk[:, lo:hi].reshape(b_blk, seq, head_dim)
        kh = qk[:, hidden + lo:hidden + hi].reshape(b_blk, seq, head_dim)
        vh = v[:, lo:hi].reshape(b_blk, seq, head_dim)

        s = jnp.einsum("bqd,bkd->bqk",
                       qh.astype(matmul_dtype), kh.astype(matmul_dtype),
                       preferred_element_type=jnp.float32) + mask_bc
        m = jnp.max(s, axis=-1, keepdims=True)          # softmax in f32
        e = jnp.exp(s - m)
        denom = jnp.sum(e, axis=-1, keepdims=True)
        if approx_recip:
            p = e * pl.reciprocal(denom, approx=True)   # EUP slot, near-free
        else:
            p = e / denom                               # exact path for strict checks

        ctx = jnp.einsum("bqk,bkd->bqd",
                         p.astype(matmul_dtype), vh.astype(matmul_dtype),
                         preferred_element_type=jnp.float32)
        # This head's rows of the output projection (avoids a lane-axis concat).
        attn = attn + mm(ctx.reshape(n, head_dim), wo[lo:hi, :])
    attn = attn + b_o

    # Residual + self_attn_layer_norm (dropout is identity at inference).
    x = hs + attn
    mu = jnp.mean(x, axis=-1, keepdims=True)
    var = jnp.mean((x - mu) ** 2, axis=-1, keepdims=True)
    x = (x - mu) * jax.lax.rsqrt(var + LN_EPS) * ln1_g + ln1_b

    # FFN: fc1 -> PReLU -> fc2, residual + final_layer_norm.
    h1 = mm(x, wfc1_ref[...]) + bfc1_ref[...]           # (n, F)
    h1 = jnp.where(h1 > 0, h1, h1 * alpha_ref[...])     # PReLU, alpha broadcast row
    h2 = mm(h1, wfc2_ref[...]) + b_fc2                  # (n, H)
    y = x + h2
    mu = jnp.mean(y, axis=-1, keepdims=True)
    var = jnp.mean((y - mu) ** 2, axis=-1, keepdims=True)
    out_ref[...] = (y - mu) * jax.lax.rsqrt(var + LN_EPS) * ln2_g + ln2_b


def _prepare_params(p, matmul_dtype):
    """Fold scaling, fuse q/k, transpose to (in, out), pack small vectors.

    Weight matrices are pre-cast to `matmul_dtype` (e.g. bf16 on v6e/v7x) so they are
    stored and DMA'd at half width; biases / LN params stay f32.
    """
    s = HEAD_DIM ** -0.5
    wqk = jnp.concatenate([p["wq"].T * s, p["wk"].T], axis=1)            # (H, 2H)
    bqk = jnp.concatenate([p["bq"] * s, p["bk"]])[None, :]               # (1, 2H)
    vecp = jnp.stack([p["bv"], p["bo"], p["bfc2"],
                      p["ln1_g"], p["ln1_b"], p["ln2_g"], p["ln2_b"]])   # (7, H)
    return dict(
        wqk=wqk.astype(matmul_dtype), bqk=bqk,
        wv=p["wv"].T.astype(matmul_dtype), wo=p["wo"].T.astype(matmul_dtype),
        wfc1=p["wfc1"].T.astype(matmul_dtype), bfc1=p["bfc1"][None, :],
        wfc2=p["wfc2"].T.astype(matmul_dtype),
        vecp=vecp,
        alpha=jnp.full((1, FFN_DIM), p["alpha"], jnp.float32),
    )


def _compact_mask(attention_mask, B, S):
    """Reduce any HF mask form to an additive (B, 1, S) key-padding bias.

    Accepts (B, 1, S, S) / (B, S, S) / (B, 1, S) / (B, S), float (additive) or bool
    (True = attend, HF convention).  Encoder masks are key-padding masks, so they are
    query-invariant and the first query row carries all information.
    """
    if attention_mask is None:
        return jnp.zeros((B, 1, S), jnp.float32)
    m = attention_mask
    if m.ndim == 4:                        # (B, 1, S, S) expanded HF form
        m = m[:, 0, 0, :]
    elif m.ndim == 3:                      # (B, S, S) or (B, 1, S)
        m = m[:, 0, :]
    if m.dtype == jnp.bool_:               # boolean key-padding: True = keep
        m = jnp.where(m, 0.0, -1e9)
    return m.astype(jnp.float32)[:, None, :]   # (B, 1, S)


def _pick_batch_block(B, S, H, F):
    """Largest divisor of B giving >= 2 grid steps, shrunk to fit a VMEM budget."""
    candidates = [d for d in range(1, max(1, B // 2) + 1) if B % d == 0] or [1]
    try:  # generation-aware budget (v7x has 64 MiB vs 128 MiB on v5e/v6e)
        vmem_budget = pltpu.get_tpu_info().vmem_capacity_bytes // 4
    except Exception:
        vmem_budget = 16 * 1024 * 1024

    def footprint(b):                      # rough f32, double-buffered estimate
        rows = b * S
        act = rows * (8 * H + F)           # hs/pos/qk/v/x/y/out + fc1 activations
        scores = 3 * b * S * S             # per-head scores/probs + broadcast mask
        return 4 * 2 * (act + scores)

    best = 1
    for d in candidates:                   # ascending; keep the largest that fits
        if footprint(d) <= vmem_budget:
            best = d
    return best


def dab_detr_encoder_layer(hidden_states, attention_mask, object_queries, params,
                           *, batch_block=None, matmul_dtype=jnp.float32,
                           approx_softmax_recip=None):
    """hidden_states/object_queries: (B, S, H); attention_mask: any HF mask form."""
    B, S, H = hidden_states.shape
    assert H == HIDDEN and H % HEADS == 0
    if batch_block is None:
        batch_block = _pick_batch_block(B, S, H, FFN_DIM)
    assert B % batch_block == 0
    n_steps = B // batch_block
    rows = batch_block * S
    if approx_softmax_recip is None:
        approx_softmax_recip = (matmul_dtype != jnp.float32)

    prep = _prepare_params(params, matmul_dtype)

    hs_flat = hidden_states.reshape(B * S, H).astype(jnp.float32)
    pos_flat = object_queries.reshape(B * S, H).astype(jnp.float32)
    mask = _compact_mask(attention_mask, B, S)          # (B, 1, S) additive bias

    kernel = functools.partial(
        _encoder_layer_kernel, b_blk=batch_block, seq=S, hidden=H,
        heads=HEADS, head_dim=HEAD_DIM, matmul_dtype=matmul_dtype,
        approx_recip=approx_softmax_recip)

    act_spec = pl.BlockSpec((rows, H), lambda i: (i, 0))
    mask_spec = pl.BlockSpec((batch_block, 1, S), lambda i: (i, 0, 0))

    def const_spec(arr):                   # parameter block, constant across the grid
        nd = arr.ndim
        return pl.BlockSpec(arr.shape, lambda i, _nd=nd: (0,) * _nd)

    in_arrays = (hs_flat, pos_flat, mask,
                 prep["wqk"], prep["bqk"], prep["wv"], prep["wo"],
                 prep["wfc1"], prep["bfc1"], prep["wfc2"],
                 prep["vecp"], prep["alpha"])
    in_specs = [act_spec, act_spec, mask_spec] + [const_spec(a) for a in in_arrays[3:]]

    fn = pl.pallas_call(
        kernel,
        out_shape=jax.ShapeDtypeStruct((B * S, H), jnp.float32),
        grid_spec=pltpu.PrefetchScalarGridSpec(
            num_scalar_prefetch=0,
            grid=(n_steps,),
            in_specs=in_specs,
            out_specs=act_spec,
        ),
        compiler_params=pltpu.CompilerParams(dimension_semantics=("parallel",)),
    )
    out = fn(*in_arrays)
    return out.reshape(B, S, H)


# ----------------------------- test harness -----------------------------------------

def _init_params(key):
    """Synthetic parameters in PyTorch layout: weights (out, in), biases (out,)."""
    ks = jax.random.split(key, 16)
    H, F = HIDDEN, FFN_DIM

    def w(k, o, i):
        return 0.05 * jax.random.normal(k, (o, i), jnp.float32)

    def b(k, o):
        return 0.05 * jax.random.normal(k, (o,), jnp.float32)

    return {
        "wq": w(ks[0], H, H), "bq": b(ks[1], H),
        "wk": w(ks[2], H, H), "bk": b(ks[3], H),
        "wv": w(ks[4], H, H), "bv": b(ks[5], H),
        "wo": w(ks[6], H, H), "bo": b(ks[7], H),
        "wfc1": w(ks[8], F, H), "bfc1": b(ks[9], F),
        "wfc2": w(ks[10], H, F), "bfc2": b(ks[11], H),
        "ln1_g": 1.0 + 0.1 * jax.random.normal(ks[12], (H,), jnp.float32),
        "ln1_b": 0.1 * jax.random.normal(ks[13], (H,), jnp.float32),
        "ln2_g": 1.0 + 0.1 * jax.random.normal(ks[14], (H,), jnp.float32),
        "ln2_b": 0.1 * jax.random.normal(ks[15], (H,), jnp.float32),
        "alpha": jnp.float32(0.25),         # nn.PReLU default init
    }


def _layer_norm(x, g, b):
    mu = jnp.mean(x, axis=-1, keepdims=True)
    var = jnp.mean((x - mu) ** 2, axis=-1, keepdims=True)
    return (x - mu) / jnp.sqrt(var + LN_EPS) * g + b


def _reference(hs, mask4, pos, p):
    """Pure-JAX mirror of the PyTorch forward (eval mode)."""
    B, S, H = hs.shape
    scale = HEAD_DIM ** -0.5
    hp = hs + pos
    q = (hp @ p["wq"].T + p["bq"]) * scale
    k = hp @ p["wk"].T + p["bk"]
    v = hs @ p["wv"].T + p["bv"]

    def split(t):
        return t.reshape(B, S, HEADS, HEAD_DIM).transpose(0, 2, 1, 3)

    qh, kh, vh = split(q), split(k), split(v)
    logits = jnp.einsum("bhqd,bhkd->bhqk", qh, kh) + mask4
    probs = jax.nn.softmax(logits.astype(jnp.float32), axis=-1)
    ctx = jnp.einsum("bhqk,bhkd->bhqd", probs, vh)
    ctx = ctx.transpose(0, 2, 1, 3).reshape(B, S, H)
    attn = ctx @ p["wo"].T + p["bo"]

    x = _layer_norm(hs + attn, p["ln1_g"], p["ln1_b"])
    h1 = x @ p["wfc1"].T + p["bfc1"]
    h1 = jnp.where(h1 > 0, h1, p["alpha"] * h1)        # PReLU
    h2 = h1 @ p["wfc2"].T + p["bfc2"]
    return _layer_norm(x + h2, p["ln2_g"], p["ln2_b"])


if __name__ == "__main__":
    key = jax.random.PRNGKey(0)
    k_hs, k_pos, k_param = jax.random.split(key, 3)

    B, S = 2, 8
    hidden_states = jax.random.normal(k_hs, (B, S, HIDDEN), jnp.float32)
    object_queries = jax.random.normal(k_pos, (B, S, HIDDEN), jnp.float32)

    # Key-padding mask expanded to (B, 1, S, S), as DabDetrEncoder does before the layer
    # (batch 1 pads its last two key positions).  The wrapper compacts it to (B, 1, S).
    key_valid = jnp.array([S, S - 2])
    padded = jnp.arange(S)[None, :] >= key_valid[:, None]          # (B, S)
    attention_mask = jnp.broadcast_to(
        jnp.where(padded, -1e9, 0.0).astype(jnp.float32)[:, None, None, :],
        (B, 1, S, S))

    params = _init_params(k_param)
    ref = _reference(hidden_states, attention_mask, object_queries, params)

    # f32 correctness path (default): strict tolerance.
    out = dab_detr_encoder_layer(hidden_states, attention_mask, object_queries, params)
    out = jax.block_until_ready(out)
    assert out.shape == (B, S, HIDDEN)
    err = jnp.max(jnp.abs(out - ref))
    assert jnp.allclose(out, ref, atol=1e-4, rtol=1e-4), f"f32 mismatch, max abs err {err}"

    # bf16 MXU-operand perf path (v5e/v6e/v7x): pre-cast weights, approx reciprocal.
    out_bf16 = dab_detr_encoder_layer(hidden_states, attention_mask, object_queries,
                                      params, matmul_dtype=jnp.bfloat16)
    out_bf16 = jax.block_until_ready(out_bf16)
    err_bf16 = jnp.max(jnp.abs(out_bf16 - ref))
    assert jnp.allclose(out_bf16, ref, atol=1e-1, rtol=1e-1), \
        f"bf16 mismatch, max abs err {err_bf16}"

    print("KERNEL_OK")
</pallas_src>

<mosaic_0001>
module attributes {stable_mosaic.version = 11 : i64} {
  func.func @_encoder_layer_kernel(%arg0: i32, %arg1: memref<8x32xf32, #tpu.memory_space<vmem>>, %arg2: memref<8x32xf32, #tpu.memory_space<vmem>>, %arg3: memref<1x1x8xf32, #tpu.memory_space<vmem>>, %arg4: memref<32x64xf32, #tpu.memory_space<vmem>>, %arg5: memref<1x64xf32, #tpu.memory_space<vmem>>, %arg6: memref<32x32xf32, #tpu.memory_space<vmem>>, %arg7: memref<32x32xf32, #tpu.memory_space<vmem>>, %arg8: memref<32x64xf32, #tpu.memory_space<vmem>>, %arg9: memref<1x64xf32, #tpu.memory_space<vmem>>, %arg10: memref<64x32xf32, #tpu.memory_space<vmem>>, %arg11: memref<7x32xf32, #tpu.memory_space<vmem>>, %arg12: memref<1x64xf32, #tpu.memory_space<vmem>>, %arg13: memref<8x32xf32, #tpu.memory_space<vmem>>) attributes {dimension_semantics = [#tpu.dimension_semantics<parallel>], iteration_bounds = array<i64: 2>, scalar_prefetch = 0 : i64, scratch_operands = 0 : i64, tpu.core_type = #tpu.core_type<tc>, window_params = [{transform_indices = @transform_0, window_bounds = array<i64: 8, 32>}, {transform_indices = @transform_1, window_bounds = array<i64: 8, 32>}, {transform_indices = @transform_2, window_bounds = array<i64: 1, 1, 8>}, {pipeline_mode = #tpu.pipeline_mode<synchronous>, transform_indices = @transform_3, window_bounds = array<i64: 32, 64>}, {pipeline_mode = #tpu.pipeline_mode<synchronous>, transform_indices = @transform_4, window_bounds = array<i64: 1, 64>}, {pipeline_mode = #tpu.pipeline_mode<synchronous>, transform_indices = @transform_5, window_bounds = array<i64: 32, 32>}, {pipeline_mode = #tpu.pipeline_mode<synchronous>, transform_indices = @transform_6, window_bounds = array<i64: 32, 32>}, {pipeline_mode = #tpu.pipeline_mode<synchronous>, transform_indices = @transform_7, window_bounds = array<i64: 32, 64>}, {pipeline_mode = #tpu.pipeline_mode<synchronous>, transform_indices = @transform_8, window_bounds = array<i64: 1, 64>}, {pipeline_mode = #tpu.pipeline_mode<synchronous>, transform_indices = @transform_9, window_bounds = array<i64: 64, 32>}, {pipeline_mode = #tpu.pipeline_mode<synchronous>, transform_indices = @transform_10, window_bounds = array<i64: 7, 32>}, {pipeline_mode = #tpu.pipeline_mode<synchronous>, transform_indices = @transform_11, window_bounds = array<i64: 1, 64>}, {transform_indices = @transform_12, window_bounds = array<i64: 8, 32>}]} {
    %c0 = arith.constant 0 : index
    %c0_0 = arith.constant 0 : index
    %0 = vector.load %arg1[%c0, %c0_0] : memref<8x32xf32, #tpu.memory_space<vmem>>, vector<8x32xf32>
    %c0_1 = arith.constant 0 : index
    %c0_2 = arith.constant 0 : index
    %1 = vector.load %arg2[%c0_1, %c0_2] : memref<8x32xf32, #tpu.memory_space<vmem>>, vector<8x32xf32>
    %2 = arith.addf %0, %1 : vector<8x32xf32>
    %c0_3 = arith.constant 0 : index
    %c0_4 = arith.constant 0 : index
    %c0_5 = arith.constant 0 : index
    %3 = vector.load %arg3[%c0_3, %c0_4, %c0_5] : memref<1x1x8xf32, #tpu.memory_space<vmem>>, vector<1x1x8xf32>
    %4 = vector.shape_cast %3 : vector<1x1x8xf32> to vector<1x1x8xf32>
    %5 = vector.broadcast %4 : vector<1x1x8xf32> to vector<1x8x8xf32>
    %c0_6 = arith.constant 0 : index
    %c0_7 = arith.constant 0 : index
    %6 = vector.load %arg11[%c0_6, %c0_7] : memref<7x32xf32, #tpu.memory_space<vmem>>, vector<7x32xf32>
    %7 = vector.extract_strided_slice %6 {offsets = [0, 0], sizes = [1, 32], strides = [1, 1]} : vector<7x32xf32> to vector<1x32xf32>
    %8 = vector.extract_strided_slice %6 {offsets = [1, 0], sizes = [1, 32], strides = [1, 1]} : vector<7x32xf32> to vector<1x32xf32>
    %9 = vector.extract_strided_slice %6 {offsets = [2, 0], sizes = [1, 32], strides = [1, 1]} : vector<7x32xf32> to vector<1x32xf32>
    %10 = vector.extract_strided_slice %6 {offsets = [3, 0], sizes = [1, 32], strides = [1, 1]} : vector<7x32xf32> to vector<1x32xf32>
    %11 = vector.extract_strided_slice %6 {offsets = [4, 0], sizes = [1, 32], strides = [1, 1]} : vector<7x32xf32> to vector<1x32xf32>
    %12 = vector.extract_strided_slice %6 {offsets = [5, 0], sizes = [1, 32], strides = [1, 1]} : vector<7x32xf32> to vector<1x32xf32>
    %13 = vector.extract_strided_slice %6 {offsets = [6, 0], sizes = [1, 32], strides = [1, 1]} : vector<7x32xf32> to vector<1x32xf32>
    %c0_8 = arith.constant 0 : index
    %c0_9 = arith.constant 0 : index
    %14 = vector.load %arg4[%c0_8, %c0_9] : memref<32x64xf32, #tpu.memory_space<vmem>>, vector<32x64xf32>
    %cst = arith.constant dense<0.000000e+00> : vector<8x64xf32>
    %15 = tpu.matmul %2, %14, %cst {dimension_numbers = #tpu.dot_dimension_numbers<[1], [0], [0], [1], [0, 0, 1, 1], [], []>} : vector<8x32xf32>, vector<32x64xf32>, vector<8x64xf32> -> vector<8x64xf32>
    %c0_10 = arith.constant 0 : index
    %c0_11 = arith.constant 0 : index
    %16 = vector.load %arg5[%c0_10, %c0_11] : memref<1x64xf32, #tpu.memory_space<vmem>>, vector<1x64xf32>
    %17 = vector.broadcast %16 : vector<1x64xf32> to vector<8x64xf32>
    %18 = arith.addf %15, %17 : vector<8x64xf32>
    %c0_12 = arith.constant 0 : index
    %c0_13 = arith.constant 0 : index
    %19 = vector.load %arg6[%c0_12, %c0_13] : memref<32x32xf32, #tpu.memory_space<vmem>>, vector<32x32xf32>
    %cst_14 = arith.constant dense<0.000000e+00> : vector<8x32xf32>
    %20 = tpu.matmul %0, %19, %cst_14 {dimension_numbers = #tpu.dot_dimension_numbers<[1], [0], [0], [1], [0, 0, 1, 1], [], []>} : vector<8x32xf32>, vector<32x32xf32>, vector<8x32xf32> -> vector<8x32xf32>
    %21 = vector.broadcast %7 : vector<1x32xf32> to vector<8x32xf32>
    %22 = arith.addf %20, %21 : vector<8x32xf32>
    %c0_15 = arith.constant 0 : index
    %c0_16 = arith.constant 0 : index
    %23 = vector.load %arg7[%c0_15, %c0_16] : memref<32x32xf32, #tpu.memory_space<vmem>>, vector<32x32xf32>
    %cst_17 = arith.constant 0.000000e+00 : f32
    %24 = vector.broadcast %cst_17 : f32 to vector<8x32xf32>
    %25 = vector.extract_strided_slice %18 {offsets = [0, 0], sizes = [8, 8], strides = [1, 1]} : vector<8x64xf32> to vector<8x8xf32>
    %26 = vector.shape_cast %25 : vector<8x8xf32> to vector<1x8x8xf32>
    %27 = vector.extract_strided_slice %18 {offsets = [0, 32], sizes = [8, 8], strides = [1, 1]} : vector<8x64xf32> to vector<8x8xf32>
    %28 = vector.shape_cast %27 : vector<8x8xf32> to vector<1x8x8xf32>
    %29 = vector.extract_strided_slice %22 {offsets = [0, 0], sizes = [8, 8], strides = [1, 1]} : vector<8x32xf32> to vector<8x8xf32>
    %30 = vector.shape_cast %29 : vector<8x8xf32> to vector<1x8x8xf32>
    "tpu.trace_start"() <{level = 10 : i32, message = "bqd,bkd->bqk"}> : () -> ()
    %cst_18 = arith.constant dense<0.000000e+00> : vector<1x8x8xf32>
    %31 = tpu.matmul %26, %28, %cst_18 {dimension_numbers = #tpu.dot_dimension_numbers<[2], [2], [1], [1], [0, 0, 0, 1, 1, 1], [0], [0]>} : vector<1x8x8xf32>, vector<1x8x8xf32>, vector<1x8x8xf32> -> vector<1x8x8xf32>
    "tpu.trace_stop"() : () -> ()
    %32 = arith.addf %31, %5 : vector<1x8x8xf32>
    %cst_19 = arith.constant dense<0xFF800000> : vector<1x8xf32>
    %33 = vector.multi_reduction <maximumf>, %32, %cst_19 [2] : vector<1x8x8xf32> to vector<1x8xf32>
    %34 = vector.shape_cast %33 : vector<1x8xf32> to vector<1x8x1xf32>
    %35 = vector.broadcast %34 : vector<1x8x1xf32> to vector<1x8x8xf32>
    %36 = arith.subf %32, %35 : vector<1x8x8xf32>
    %37 = math.exp %36 : vector<1x8x8xf32>
    %cst_20 = arith.constant dense<0.000000e+00> : vector<1x8xf32>
    %38 = vector.multi_reduction <add>, %37, %cst_20 [2] : vector<1x8x8xf32> to vector<1x8xf32>
    %39 = vector.shape_cast %38 : vector<1x8xf32> to vector<1x8x1xf32>
    %40 = vector.broadcast %39 : vector<1x8x1xf32> to vector<1x8x8xf32>
    %41 = arith.divf %37, %40 : vector<1x8x8xf32>
    "tpu.trace_start"() <{level = 10 : i32, message = "bqk,bkd->bqd"}> : () -> ()
    %cst_21 = arith.constant dense<0.000000e+00> : vector<1x8x8xf32>
    %42 = tpu.matmul %41, %30, %cst_21 {dimension_numbers = #tpu.dot_dimension_numbers<[2], [1], [1], [2], [0, 0, 0, 1, 1, 2], [0], [0]>} : vector<1x8x8xf32>, vector<1x8x8xf32>, vector<1x8x8xf32> -> vector<1x8x8xf32>
    "tpu.trace_stop"() : () -> ()
    %43 = vector.shape_cast %42 : vector<1x8x8xf32> to vector<8x8xf32>
    %44 = vector.extract_strided_slice %23 {offsets = [0, 0], sizes = [8, 32], strides = [1, 1]} : vector<32x32xf32> to vector<8x32xf32>
    %cst_22 = arith.constant dense<0.000000e+00> : vector<8x32xf32>
    %45 = tpu.matmul %43, %44, %cst_22 {dimension_numbers = #tpu.dot_dimension_numbers<[1], [0], [0], [1], [0, 0, 1, 1], [], []>} : vector<8x8xf32>, vector<8x32xf32>, vector<8x32xf32> -> vector<8x32xf32>
    %46 = arith.addf %24, %45 : vector<8x32xf32>
    %47 = vector.extract_strided_slice %18 {offsets = [0, 8], sizes = [8, 8], strides = [1, 1]} : vector<8x64xf32> to vector<8x8xf32>
    %48 = vector.shape_cast %47 : vector<8x8xf32> to vector<1x8x8xf32>
    %49 = vector.extract_strided_slice %18 {offsets = [0, 40], sizes = [8, 8], strides = [1, 1]} : vector<8x64xf32> to vector<8x8xf32>
    %50 = vector.shape_cast %49 : vector<8x8xf32> to vector<1x8x8xf32>
    %51 = vector.extract_strided_slice %22 {offsets = [0, 8], sizes = [8, 8], strides = [1, 1]} : vector<8x32xf32> to vector<8x8xf32>
    %52 = vector.shape_cast %51 : vector<8x8xf32> to vector<1x8x8xf32>
    "tpu.trace_start"() <{level = 10 : i32, message = "bqd,bkd->bqk"}> : () -> ()
    %cst_23 = arith.constant dense<0.000000e+00> : vector<1x8x8xf32>
    %53 = tpu.matmul %48, %50, %cst_23 {dimension_numbers = #tpu.dot_dimension_numbers<[2], [2], [1], [1], [0, 0, 0, 1, 1, 1], [0], [0]>} : vector<1x8x8xf32>, vector<1x8x8xf32>, vector<1x8x8xf32> -> vector<1x8x8xf32>
    "tpu.trace_stop"() : () -> ()
    %54 = arith.addf %53, %5 : vector<1x8x8xf32>
    %cst_24 = arith.constant dense<0xFF800000> : vector<1x8xf32>
    %55 = vector.multi_reduction <maximumf>, %54, %cst_24 [2] : vector<1x8x8xf32> to vector<1x8xf32>
    %56 = vector.shape_cast %55 : vector<1x8xf32> to vector<1x8x1xf32>
    %57 = vector.broadcast %56 : vector<1x8x1xf32> to vector<1x8x8xf32>
    %58 = arith.subf %54, %57 : vector<1x8x8xf32>
    %59 = math.exp %58 : vector<1x8x8xf32>
    %cst_25 = arith.constant dense<0.000000e+00> : vector<1x8xf32>
    %60 = vector.multi_reduction <add>, %59, %cst_25 [2] : vector<1x8x8xf32> to vector<1x8xf32>
    %61 = vector.shape_cast %60 : vector<1x8xf32> to vector<1x8x1xf32>
    %62 = vector.broadcast %61 : vector<1x8x1xf32> to vector<1x8x8xf32>
    %63 = arith.divf %59, %62 : vector<1x8x8xf32>
    "tpu.trace_start"() <{level = 10 : i32, message = "bqk,bkd->bqd"}> : () -> ()
    %cst_26 = arith.constant dense<0.000000e+00> : vector<1x8x8xf32>
    %64 = tpu.matmul %63, %52, %cst_26 {dimension_numbers = #tpu.dot_dimension_numbers<[2], [1], [1], [2], [0, 0, 0, 1, 1, 2], [0], [0]>} : vector<1x8x8xf32>, vector<1x8x8xf32>, vector<1x8x8xf32> -> vector<1x8x8xf32>
    "tpu.trace_stop"() : () -> ()
    %65 = vector.shape_cast %64 : vector<1x8x8xf32> to vector<8x8xf32>
    %66 = vector.extract_strided_slice %23 {offsets = [8, 0], sizes = [8, 32], strides = [1, 1]} : vector<32x32xf32> to vector<8x32xf32>
    %cst_27 = arith.constant dense<0.000000e+00> : vector<8x32xf32>
    %67 = tpu.matmul %65, %66, %cst_27 {dimension_numbers = #tpu.dot_dimension_numbers<[1], [0], [0], [1], [0, 0, 1, 1], [], []>} : vector<8x8xf32>, vector<8x32xf32>, vector<8x32xf32> -> vector<8x32xf32>
    %68 = arith.addf %46, %67 : vector<8x32xf32>
    %69 = vector.extract_strided_slice %18 {offsets = [0, 16], sizes = [8, 8], strides = [1, 1]} : vector<8x64xf32> to vector<8x8xf32>
    %70 = vector.shape_cast %69 : vector<8x8xf32> to vector<1x8x8xf32>
    %71 = vector.extract_strided_slice %18 {offsets = [0, 48], sizes = [8, 8], strides = [1, 1]} : vector<8x64xf32> to vector<8x8xf32>
    %72 = vector.shape_cast %71 : vector<8x8xf32> to vector<1x8x8xf32>
    %73 = vector.extract_strided_slice %22 {offsets = [0, 16], sizes = [8, 8], strides = [1, 1]} : vector<8x32xf32> to vector<8x8xf32>
    %74 = vector.shape_cast %73 : vector<8x8xf32> to vector<1x8x8xf32>
    "tpu.trace_start"() <{level = 10 : i32, message = "bqd,bkd->bqk"}> : () -> ()
    %cst_28 = arith.constant dense<0.000000e+00> : vector<1x8x8xf32>
    %75 = tpu.matmul %70, %72, %cst_28 {dimension_numbers = #tpu.dot_dimension_numbers<[2], [2], [1], [1], [0, 0, 0, 1, 1, 1], [0], [0]>} : vector<1x8x8xf32>, vector<1x8x8xf32>, vector<1x8x8xf32> -> vector<1x8x8xf32>
    "tpu.trace_stop"() : () -> ()
    %76 = arith.addf %75, %5 : vector<1x8x8xf32>
    %cst_29 = arith.constant dense<0xFF800000> : vector<1x8xf32>
    %77 = vector.multi_reduction <maximumf>, %76, %cst_29 [2] : vector<1x8x8xf32> to vector<1x8xf32>
    %78 = vector.shape_cast %77 : vector<1x8xf32> to vector<1x8x1xf32>
    %79 = vector.broadcast %78 : vector<1x8x1xf32> to vector<1x8x8xf32>
    %80 = arith.subf %76, %79 : vector<1x8x8xf32>
    %81 = math.exp %80 : vector<1x8x8xf32>
    %cst_30 = arith.constant dense<0.000000e+00> : vector<1x8xf32>
    %82 = vector.multi_reduction <add>, %81, %cst_30 [2] : vector<1x8x8xf32> to vector<1x8xf32>
    %83 = vector.shape_cast %82 : vector<1x8xf32> to vector<1x8x1xf32>
    %84 = vector.broadcast %83 : vector<1x8x1xf32> to vector<1x8x8xf32>
    %85 = arith.divf %81, %84 : vector<1x8x8xf32>
    "tpu.trace_start"() <{level = 10 : i32, message = "bqk,bkd->bqd"}> : () -> ()
    %cst_31 = arith.constant dense<0.000000e+00> : vector<1x8x8xf32>
    %86 = tpu.matmul %85, %74, %cst_31 {dimension_numbers = #tpu.dot_dimension_numbers<[2], [1], [1], [2], [0, 0, 0, 1, 1, 2], [0], [0]>} : vector<1x8x8xf32>, vector<1x8x8xf32>, vector<1x8x8xf32> -> vector<1x8x8xf32>
    "tpu.trace_stop"() : () -> ()
    %87 = vector.shape_cast %86 : vector<1x8x8xf32> to vector<8x8xf32>
    %88 = vector.extract_strided_slice %23 {offsets = [16, 0], sizes = [8, 32], strides = [1, 1]} : vector<32x32xf32> to vector<8x32xf32>
    %cst_32 = arith.constant dense<0.000000e+00> : vector<8x32xf32>
    %89 = tpu.matmul %87, %88, %cst_32 {dimension_numbers = #tpu.dot_dimension_numbers<[1], [0], [0], [1], [0, 0, 1, 1], [], []>} : vector<8x8xf32>, vector<8x32xf32>, vector<8x32xf32> -> vector<8x32xf32>
    %90 = arith.addf %68, %89 : vector<8x32xf32>
    %91 = vector.extract_strided_slice %18 {offsets = [0, 24], sizes = [8, 8], strides = [1, 1]} : vector<8x64xf32> to vector<8x8xf32>
    %92 = vector.shape_cast %91 : vector<8x8xf32> to vector<1x8x8xf32>
    %93 = vector.extract_strided_slice %18 {offsets = [0, 56], sizes = [8, 8], strides = [1, 1]} : vector<8x64xf32> to vector<8x8xf32>
    %94 = vector.shape_cast %93 : vector<8x8xf32> to vector<1x8x8xf32>
    %95 = vector.extract_strided_slice %22 {offsets = [0, 24], sizes = [8, 8], strides = [1, 1]} : vector<8x32xf32> to vector<8x8xf32>
    %96 = vector.shape_cast %95 : vector<8x8xf32> to vector<1x8x8xf32>
    "tpu.trace_start"() <{level = 10 : i32, message = "bqd,bkd->bqk"}> : () -> ()
    %cst_33 = arith.constant dense<0.000000e+00> : vector<1x8x8xf32>
    %97 = tpu.matmul %92, %94, %cst_33 {dimension_numbers = #tpu.dot_dimension_numbers<[2], [2], [1], [1], [0, 0, 0, 1, 1, 1], [0], [0]>} : vector<1x8x8xf32>, vector<1x8x8xf32>, vector<1x8x8xf32> -> vector<1x8x8xf32>
    "tpu.trace_stop"() : () -> ()
    %98 = arith.addf %97, %5 : vector<1x8x8xf32>
    %cst_34 = arith.constant dense<0xFF800000> : vector<1x8xf32>
    %99 = vector.multi_reduction <maximumf>, %98, %cst_34 [2] : vector<1x8x8xf32> to vector<1x8xf32>
    %100 = vector.shape_cast %99 : vector<1x8xf32> to vector<1x8x1xf32>
    %101 = vector.broadcast %100 : vector<1x8x1xf32> to vector<1x8x8xf32>
    %102 = arith.subf %98, %101 : vector<1x8x8xf32>
    %103 = math.exp %102 : vector<1x8x8xf32>
    %cst_35 = arith.constant dense<0.000000e+00> : vector<1x8xf32>
    %104 = vector.multi_reduction <add>, %103, %cst_35 [2] : vector<1x8x8xf32> to vector<1x8xf32>
    %105 = vector.shape_cast %104 : vector<1x8xf32> to vector<1x8x1xf32>
    %106 = vector.broadcast %105 : vector<1x8x1xf32> to vector<1x8x8xf32>
    %107 = arith.divf %103, %106 : vector<1x8x8xf32>
    "tpu.trace_start"() <{level = 10 : i32, message = "bqk,bkd->bqd"}> : () -> ()
    %cst_36 = arith.constant dense<0.000000e+00> : vector<1x8x8xf32>
    %108 = tpu.matmul %107, %96, %cst_36 {dimension_numbers = #tpu.dot_dimension_numbers<[2], [1], [1], [2], [0, 0, 0, 1, 1, 2], [0], [0]>} : vector<1x8x8xf32>, vector<1x8x8xf32>, vector<1x8x8xf32> -> vector<1x8x8xf32>
    "tpu.trace_stop"() : () -> ()
    %109 = vector.shape_cast %108 : vector<1x8x8xf32> to vector<8x8xf32>
    %110 = vector.extract_strided_slice %23 {offsets = [24, 0], sizes = [8, 32], strides = [1, 1]} : vector<32x32xf32> to vector<8x32xf32>
    %cst_37 = arith.constant dense<0.000000e+00> : vector<8x32xf32>
    %111 = tpu.matmul %109, %110, %cst_37 {dimension_numbers = #tpu.dot_dimension_numbers<[1], [0], [0], [1], [0, 0, 1, 1], [], []>} : vector<8x8xf32>, vector<8x32xf32>, vector<8x32xf32> -> vector<8x32xf32>
    %112 = arith.addf %90, %111 : vector<8x32xf32>
    %113 = vector.broadcast %8 : vector<1x32xf32> to vector<8x32xf32>
    %114 = arith.addf %112, %113 : vector<8x32xf32>
    %115 = arith.addf %0, %114 : vector<8x32xf32>
    %cst_38 = arith.constant dense<0.000000e+00> : vector<8xf32>
    %116 = vector.multi_reduction <add>, %115, %cst_38 [1] : vector<8x32xf32> to vector<8xf32>
    %117 = vector.shape_cast %116 : vector<8xf32> to vector<8x1xf32>
    %cst_39 = arith.constant 3.200000e+01 : f32
    %118 = vector.broadcast %cst_39 : f32 to vector<8x1xf32>
    %119 = arith.divf %117, %118 : vector<8x1xf32>
    %120 = vector.broadcast %119 : vector<8x1xf32> to vector<8x32xf32>
    %121 = arith.subf %115, %120 : vector<8x32xf32>
    %122 = arith.mulf %121, %121 : vector<8x32xf32>
    %cst_40 = arith.constant dense<0.000000e+00> : vector<8xf32>
    %123 = vector.multi_reduction <add>, %122, %cst_40 [1] : vector<8x32xf32> to vector<8xf32>
    %124 = vector.shape_cast %123 : vector<8xf32> to vector<8x1xf32>
    %cst_41 = arith.constant 3.200000e+01 : f32
    %125 = vector.broadcast %cst_41 : f32 to vector<8x1xf32>
    %126 = arith.divf %124, %125 : vector<8x1xf32>
    %127 = vector.broadcast %119 : vector<8x1xf32> to vector<8x32xf32>
    %128 = arith.subf %115, %127 : vector<8x32xf32>
    %cst_42 = arith.constant 9.99999974E-6 : f32
    %129 = vector.broadcast %cst_42 : f32 to vector<8x1xf32>
    %130 = arith.addf %126, %129 : vector<8x1xf32>
    %131 = math.rsqrt %130 : vector<8x1xf32>
    %132 = vector.broadcast %131 : vector<8x1xf32> to vector<8x32xf32>
    %133 = arith.mulf %128, %132 : vector<8x32xf32>
    %134 = vector.broadcast %10 : vector<1x32xf32> to vector<8x32xf32>
    %135 = arith.mulf %133, %134 : vector<8x32xf32>
    %136 = vector.broadcast %11 : vector<1x32xf32> to vector<8x32xf32>
    %137 = arith.addf %135, %136 : vector<8x32xf32>
    %c0_43 = arith.constant 0 : index
    %c0_44 = arith.constant 0 : index
    %138 = vector.load %arg8[%c0_43, %c0_44] : memref<32x64xf32, #tpu.memory_space<vmem>>, vector<32x64xf32>
    %cst_45 = arith.constant dense<0.000000e+00> : vector<8x64xf32>
    %139 = tpu.matmul %137, %138, %cst_45 {dimension_numbers = #tpu.dot_dimension_numbers<[1], [0], [0], [1], [0, 0, 1, 1], [], []>} : vector<8x32xf32>, vector<32x64xf32>, vector<8x64xf32> -> vector<8x64xf32>
    %c0_46 = arith.constant 0 : index
    %c0_47 = arith.constant 0 : index
    %140 = vector.load %arg9[%c0_46, %c0_47] : memref<1x64xf32, #tpu.memory_space<vmem>>, vector<1x64xf32>
    %141 = vector.broadcast %140 : vector<1x64xf32> to vector<8x64xf32>
    %142 = arith.addf %139, %141 : vector<8x64xf32>
    %cst_48 = arith.constant 0.000000e+00 : f32
    %143 = vector.broadcast %cst_48 : f32 to vector<8x64xf32>
    %144 = arith.cmpf ogt, %142, %143 : vector<8x64xf32>
    %c0_49 = arith.constant 0 : index
    %c0_50 = arith.constant 0 : index
    %145 = vector.load %arg12[%c0_49, %c0_50] : memref<1x64xf32, #tpu.memory_space<vmem>>, vector<1x64xf32>
    %146 = vector.broadcast %145 : vector<1x64xf32> to vector<8x64xf32>
    %147 = arith.mulf %142, %146 : vector<8x64xf32>
    %148 = arith.select %144, %142, %147 : vector<8x64xi1>, vector<8x64xf32>
    %c0_51 = arith.constant 0 : index
    %c0_52 = arith.constant 0 : index
    %149 = vector.load %arg10[%c0_51, %c0_52] : memref<64x32xf32, #tpu.memory_space<vmem>>, vector<64x32xf32>
    %cst_53 = arith.constant dense<0.000000e+00> : vector<8x32xf32>
    %150 = tpu.matmul %148, %149, %cst_53 {dimension_numbers = #tpu.dot_dimension_numbers<[1], [0], [0], [1], [0, 0, 1, 1], [], []>} : vector<8x64xf32>, vector<64x32xf32>, vector<8x32xf32> -> vector<8x32xf32>
    %151 = vector.broadcast %9 : vector<1x32xf32> to vector<8x32xf32>
    %152 = arith.addf %150, %151 : vector<8x32xf32>
    %153 = arith.addf %137, %152 : vector<8x32xf32>
    %cst_54 = arith.constant dense<0.000000e+00> : vector<8xf32>
    %154 = vector.multi_reduction <add>, %153, %cst_54 [1] : vector<8x32xf32> to vector<8xf32>
    %155 = vector.shape_cast %154 : vector<8xf32> to vector<8x1xf32>
    %cst_55 = arith.constant 3.200000e+01 : f32
    %156 = vector.broadcast %cst_55 : f32 to vector<8x1xf32>
    %157 = arith.divf %155, %156 : vector<8x1xf32>
    %158 = vector.broadcast %157 : vector<8x1xf32> to vector<8x32xf32>
    %159 = arith.subf %153, %158 : vector<8x32xf32>
    %160 = arith.mulf %159, %159 : vector<8x32xf32>
    %cst_56 = arith.constant dense<0.000000e+00> : vector<8xf32>
    %161 = vector.multi_reduction <add>, %160, %cst_56 [1] : vector<8x32xf32> to vector<8xf32>
    %162 = vector.shape_cast %161 : vector<8xf32> to vector<8x1xf32>
    %cst_57 = arith.constant 3.200000e+01 : f32
    %163 = vector.broadcast %cst_57 : f32 to vector<8x1xf32>
    %164 = arith.divf %162, %163 : vector<8x1xf32>
    %165 = vector.broadcast %157 : vector<8x1xf32> to vector<8x32xf32>
    %166 = arith.subf %153, %165 : vector<8x32xf32>
    %cst_58 = arith.constant 9.99999974E-6 : f32
    %167 = vector.broadcast %cst_58 : f32 to vector<8x1xf32>
    %168 = arith.addf %164, %167 : vector<8x1xf32>
    %169 = math.rsqrt %168 : vector<8x1xf32>
    %170 = vector.broadcast %169 : vector<8x1xf32> to vector<8x32xf32>
    %171 = arith.mulf %166, %170 : vector<8x32xf32>
    %172 = vector.broadcast %12 : vector<1x32xf32> to vector<8x32xf32>
    %173 = arith.mulf %171, %172 : vector<8x32xf32>
    %174 = vector.broadcast %13 : vector<1x32xf32> to vector<8x32xf32>
    %175 = arith.addf %173, %174 : vector<8x32xf32>
    %c0_59 = arith.constant 0 : index
    %c0_60 = arith.constant 0 : index
    %176 = vector.load %arg13[%c0_59, %c0_60] : memref<8x32xf32, #tpu.memory_space<vmem>>, vector<8x32xf32>
    tpu.vector_store %arg13[%c0_59, %c0_60], %175 {strides = array<i32>} : memref<8x32xf32, #tpu.memory_space<vmem>>, vector<8x32xf32>,
    return
  }
  func.func @transform_0(%arg0: i32) -> (i32, i32) {
    %c0_i32 = arith.constant 0 : i32
    %c0_i32_0 = arith.constant 0 : i32
    return %arg0, %c0_i32 : i32, i32
  }
  func.func @transform_1(%arg0: i32) -> (i32, i32) {
    %c0_i32 = arith.constant 0 : i32
    %c0_i32_0 = arith.constant 0 : i32
    return %arg0, %c0_i32 : i32, i32
  }
  func.func @transform_2(%arg0: i32) -> (i32, i32, i32) {
    %c0_i32 = arith.constant 0 : i32
    %c0_i32_0 = arith.constant 0 : i32
    %c0_i32_1 = arith.constant 0 : i32
    return %arg0, %c0_i32, %c0_i32_0 : i32, i32, i32
  }
  func.func @transform_3(%arg0: i32) -> (i32, i32) {
    %c0_i32 = arith.constant 0 : i32
    %c0_i32_0 = arith.constant 0 : i32
    %c0_i32_1 = arith.constant 0 : i32
    return %c0_i32, %c0_i32_0 : i32, i32
  }
  func.func @transform_4(%arg0: i32) -> (i32, i32) {
    %c0_i32 = arith.constant 0 : i32
    %c0_i32_0 = arith.constant 0 : i32
    %c0_i32_1 = arith.constant 0 : i32
    return %c0_i32, %c0_i32_0 : i32, i32
  }
  func.func @transform_5(%arg0: i32) -> (i32, i32) {
    %c0_i32 = arith.constant 0 : i32
    %c0_i32_0 = arith.constant 0 : i32
    %c0_i32_1 = arith.constant 0 : i32
    return %c0_i32, %c0_i32_0 : i32, i32
  }
  func.func @transform_6(%arg0: i32) -> (i32, i32) {
    %c0_i32 = arith.constant 0 : i32
    %c0_i32_0 = arith.constant 0 : i32
    %c0_i32_1 = arith.constant 0 : i32
    return %c0_i32, %c0_i32_0 : i32, i32
  }
  func.func @transform_7(%arg0: i32) -> (i32, i32) {
    %c0_i32 = arith.constant 0 : i32
    %c0_i32_0 = arith.constant 0 : i32
    %c0_i32_1 = arith.constant 0 : i32
    return %c0_i32, %c0_i32_0 : i32, i32
  }
  func.func @transform_8(%arg0: i32) -> (i32, i32) {
    %c0_i32 = arith.constant 0 : i32
    %c0_i32_0 = arith.constant 0 : i32
    %c0_i32_1 = arith.constant 0 : i32
    return %c0_i32, %c0_i32_0 : i32, i32
  }
  func.func @transform_9(%arg0: i32) -> (i32, i32) {
    %c0_i32 = arith.constant 0 : i32
    %c0_i32_0 = arith.constant 0 : i32
    %c0_i32_1 = arith.constant 0 : i32
    return %c0_i32, %c0_i32_0 : i32, i32
  }
  func.func @transform_10(%arg0: i32) -> (i32, i32) {
    %c0_i32 = arith.constant 0 : i32
    %c0_i32_0 = arith.constant 0 : i32
    %c0_i32_1 = arith.constant 0 : i32
    return %c0_i32, %c0_i32_0 : i32, i32
  }
  func.func @transform_11(%arg0: i32) -> (i32, i32) {
    %c0_i32 = arith.constant 0 : i32
    %c0_i32_0 = arith.constant 0 : i32
    %c0_i32_1 = arith.constant 0 : i32
    return %c0_i32, %c0_i32_0 : i32, i32
  }
  func.func @transform_12(%arg0: i32) -> (i32, i32) {
    %c0_i32 = arith.constant 0 : i32
    %c0_i32_0 = arith.constant 0 : i32
    return %arg0, %c0_i32 : i32, i32
  }
}

</mosaic_0001>

<bundles_post_ra>
// kernel: tpu_custom_call.1
= control target key start
LH: loop header
LB: loop body
LE: loop exit
PB: predicated region body
PF: predicated region fallthrough
CT: control target
= control target key end

     0   :  { %s3287_s0 = inlined_call_operand.hbm [shape: f32[16,32], index: 0, kind: input, shape index: {}]   ;;  %s3288_s1 = inlined_call_operand.hbm [shape: f32[16,32], index: 1, kind: input, shape index: {}]   ;;  %s3289_s2 = inlined_call_operand.vmem [shape: f32[2,1,8], index: 2, kind: input, shape index: {}]   ;;  %s3290_s3 = inlined_call_operand.vmem [shape: f32[32,64], index: 3, kind: input, shape index: {}]   ;;  %s3291_s4 = inlined_call_operand.hbm [shape: f32[1,64], index: 4, kind: input, shape index: {}]   ;;  %s3292_s5 = inlined_call_operand.vmem [shape: f32[32,32], index: 5, kind: input, shape index: {}]   ;;  %s3293_s6 = inlined_call_operand.vmem [shape: f32[32,32], index: 6, kind: input, shape index: {}]   ;;  %s3294_s7 = inlined_call_operand.hbm [shape: f32[32,64], index: 7, kind: input, shape index: {}]   ;;  %s3295_s8 = inlined_call_operand.hbm [shape: f32[1,64], index: 8, kind: input, shape index: {}]   ;;  %s3296_s9 = inlined_call_operand.vmem [shape: f32[64,32], index: 9, kind: input, shape index: {}]   ;;  %s3297_s10 = inlined_call_operand.hbm [shape: f32[7,32], index: 10, kind: input, shape index: {}]   ;;  %s3298_s11 = inlined_call_operand.vmem [shape: f32[1,64], index: 11, kind: input, shape index: {}]   ;;  %s3299_s12 = inlined_call_operand.hbm [shape: f32[16,32], index: 12, kind: output, shape index: {}]  }
   0x1   :  { %3308 = sst [smem:[#allocation23_spill]] %s3291_s4 }
   0x2   :  { %3309 = sst [smem:[#allocation24_spill]] %s3294_s7 }
   0x3   :  { %3310 = sst [smem:[#allocation25_spill]] %s3295_s8 }
   0x4   :  { %3311 = sst [smem:[#allocation26_spill]] %s3297_s10 }
   0x5   :  { %3312 = sst [smem:[#allocation27_spill]] %s3298_s11 }
   0x6   :  { %3313 = sst [smem:[#allocation28_spill]] %s3299_s12 }
   0x7   :  { %17 = vsyncpa [#allocation3], 0 }
   0x8   :  { %19 = vsyncpa [#allocation3 + $0x1], 0 }
   0x9   :  { %20 = vsyncpa [#allocation6], 0 }
   0xa   :  { %22 = vsyncpa [#allocation6 + $0x1], 0 }
   0xb   :  { %23 = vsyncpa [#allocation9], 0 }
   0xc   :  { %24 = vsyncpa [#allocation12], 0 }
   0xd   :  { %25 = vsyncpa [#allocation4], 0 }
   0xe   :  { %27 = vsyncpa [#allocation4 + $0x1], 0  ;;  %s2755_s21 = smov 0   ;;  %s2757_s22 = smov 0  }
   0xf   :  { %s2759_s23 = smov 0   ;;  %s2761_s24 = smov 0  }
  0x10 LB: > { %3314 = sst [smem:[#allocation20_spill]] %s2665_s23  ;;  %s2671_s25 = smov [#allocation7]   ;;  %s2669_s24 = sphi %s2761_s24, %s3343_s24   ;;  %s2665_s23 = sphi %s2759_s23, %s3345_s23   ;;  %s2661_s22 = sphi %s2757_s22, %s3347_s22   ;;  %s2657_s21 = sphi %s2755_s21, %s3346_s21  }
  0x11   : > { %s347_s26 = sshll.u32 %s2671_s25, 4  ;;  %s2776_s27 = sadd.s32 4294967295, %s2669_s24   ;;  %s2781_s26 = int_to_ptr.vmem [resolvable:$true] %s347_s26 }
  0x12   : > { %p2055_p0 = scmp.ge.s32.totalorder %s2669_s24, 1  ;;  %p3301_p1 = scmp.eq.s32.totalorder %s2776_s27, 0 }
  0x13   : > { %p331_p2 = scmp.lt.s32.totalorder %s2669_s24, 3  ;;  %s2672_s29 = smov [#allocation8]  }
  0x14   : > { %s363_s30 = sshll.u32 %s2672_s29, 4  ;;  %s2673_s14 = smov [#allocation10]   ;;  %s2790_s30 = int_to_ptr.vmem [resolvable:$true] %s363_s30 }
  0x15   : > { %p2783_p3 = pnand %p2055_p0, %p331_p2  ;;  %s377_s15 = sshll.u32 %s2673_s14, 4  ;;  %s2798_s15 = int_to_ptr.vmem [resolvable:$true] %s377_s15 }
  0x16   : > { %s3317_s4 = sld [smem:[#allocation23_spill]] }
  0x17   : > { %s3315_s28 = scalar_select %p2783_p3, 1, 0 }
  0x18   : > { %p2313_p5 = pneg %p2783_p3 }
  0x1a   : > { %p2794_p6 = pnand %p2313_p5, %p3301_p1 }
  0x1c   : > { %s2415_s18 = scalar_lea.hbm %s3317_s4, 16  ;;  %p2808_p8 = pneg %p2794_p6 }
  0x1d   : > { %p2416_p7 = scmp.ne.s32.totalorder %s3317_s4, %s2415_s18  ;;  %p2422_p11 = scmp.lt.u32.totalorder %s2415_s18, %s3317_s4 }
  0x1f   : > { %p2418_p9 = pnand %p2808_p8, %p2416_p7 }
  0x21   : > { %p2419_p10 = pneg %p2418_p9 }
  0x23   : > { %p2424_p12 = pnand %p2422_p11, %p2419_p10 }
  0x25   : > { %2427 = shalt.err (!%p2424_p12)
}
  0x26   : > { %s2428_s16 = scalar_lea.vmem %s2781_s26, 16  ;;  %s2435_s17 = scalar_lea.vmem %s2781_s26, 32 }
  0x27   : > { %p2429_p13 = scmp.ne.s32.totalorder %s2781_s26, %s2428_s16  ;;  %p2436_p5 = scmp.lt.s32.totalorder %s2781_s26, %s2781_s26 }
  0x28   : > { %p2437_p7 = scmp.lt.s32.totalorder %s2435_s17, %s2428_s16 }
  0x29   : > { %p2431_p0 = pnand %p2429_p13, %p2808_p8 }
  0x2a   : > { %p2438_p9 = por %p2437_p7, %p2436_p5 }
  0x2b   : > { %p2432_p2 = pneg %p2431_p0 }
  0x2d   : > { %p2439_p4 = pnand %p2438_p9, %p2432_p2 }
  0x2f   : > { %2442 = shalt.err (!%p2439_p4)
}
  0x30   : > { %2316 = dma.hbm_to_vmem [thread:$0]  (!%p2794_p6), %s3317_s4, 16, %s2781_s26, [#allocation6]  }
  0x31   : > { %s3319_s7 = sld [smem:[#allocation24_spill]] }
  0x37   : > { %s2443_s14 = scalar_lea.hbm %s3319_s7, 512 }
  0x38   : > { %p2444_p10 = scmp.ne.s32.totalorder %s3319_s7, %s2443_s14  ;;  %p2450_p4 = scmp.lt.u32.totalorder %s2443_s14, %s3319_s7 }
  0x3a   : > { %p2446_p11 = pnand %p2444_p10, %p2808_p8 }
  0x3c   : > { %p2447_p12 = pneg %p2446_p11 }
  0x3e   : > { %p2452_p13 = pnand %p2450_p4, %p2447_p12 }
  0x40   : > { %2455 = shalt.err (!%p2452_p13)
}
  0x41   : > { %s2456_s26 = scalar_lea.vmem %s2790_s30, 512  ;;  %p2464_p7 = scmp.lt.s32.totalorder %s2790_s30, %s2790_s30 }
  0x42   : > { %p2457_p0 = scmp.ne.s32.totalorder %s2790_s30, %s2456_s26  ;;  %p2465_p9 = scmp.lt.s32.totalorder %s2456_s26, %s2456_s26 }
  0x44   : > { %p2459_p2 = pnand %p2457_p0, %p2808_p8  ;;  %p2466_p10 = por %p2465_p9, %p2464_p7 }
  0x46   : > { %p2460_p5 = pneg %p2459_p2 }
  0x48   : > { %p2467_p11 = pnand %p2466_p10, %p2460_p5 }
  0x4a   : > { %2470 = shalt.err (!%p2467_p11)
}
  0x4b   : > { %s2674_s11 = smov 128   ;;  %s2675_s12 = smov 8  }
  0x4c   : > { %2319 = dma.hbm_to_vmem [thread:$0]  (!%p2794_p6), %s3319_s7, 512, %s2790_s30, [#allocation9], %s2674_s11, %s2674_s11, %s2675_s12  }
  0x4d   : > { %s3320_s8 = sld [smem:[#allocation25_spill]] }
  0x53   : > { %s2471_s14 = scalar_lea.hbm %s3320_s8, 16 }
  0x54   : > { %p2472_p12 = scmp.ne.s32.totalorder %s3320_s8, %s2471_s14  ;;  %p2478_p0 = scmp.lt.u32.totalorder %s2471_s14, %s3320_s8 }
  0x56   : > { %p2474_p4 = pnand %p2472_p12, %p2808_p8 }
  0x58   : > { %p2475_p13 = pneg %p2474_p4 }
  0x5a   : > { %p2480_p2 = pnand %p2478_p0, %p2475_p13 }
  0x5c   : > { %2483 = shalt.err (!%p2480_p2)
}
  0x5d   : > { %s2484_s30 = scalar_lea.vmem %s2798_s15, 16  ;;  %s2491_s11 = scalar_lea.vmem %s2798_s15, 32 }
  0x5e   : > { %p2485_p5 = scmp.ne.s32.totalorder %s2798_s15, %s2484_s30  ;;  %p2492_p10 = scmp.lt.s32.totalorder %s2798_s15, %s2798_s15 }
  0x5f   : > { %p2493_p11 = scmp.lt.s32.totalorder %s2491_s11, %s2484_s30 }
  0x60   : > { %p2487_p7 = pnand %p2485_p5, %p2808_p8 }
  0x61   : > { %p2494_p12 = por %p2493_p11, %p2492_p10 }
  0x62   : > { %p2488_p9 = pneg %p2487_p7 }
  0x64   : > { %p2495_p4 = pnand %p2494_p12, %p2488_p9 }
  0x66   : > { %2498 = shalt.err (!%p2495_p4)
}
  0x67   : > { %2322 = dma.hbm_to_vmem [thread:$0]  (!%p2794_p6), %s3320_s8, 16, %s2798_s15, [#allocation9]  }
  0x68   : > { %s2676_s18 = smov [#allocation11]   ;;  %s3321_s10 = sld [smem:[#allocation26_spill]] }
  0x69   : > { %s391_s19 = sshll.u32 %s2676_s18, 4  ;;  %s392_s19 = int_to_ptr.vmem [resolvable:$true] %s391_s19 }
  0x6e   : > { %s2499_s14 = scalar_lea.hbm %s3321_s10, 128 }
  0x6f   : > { %p2500_p13 = scmp.ne.s32.totalorder %s3321_s10, %s2499_s14  ;;  %p2506_p5 = scmp.lt.u32.totalorder %s2499_s14, %s3321_s10 }
  0x71   : > { %p2502_p0 = pnand %p2500_p13, %p2808_p8 }
  0x73   : > { %p2503_p2 = pneg %p2502_p0 }
  0x75   : > { %p2508_p7 = pnand %p2506_p5, %p2503_p2 }
  0x77   : > { %2511 = shalt.err (!%p2508_p7)
}
  0x78   : > { %s2512_s15 = scalar_lea.vmem %s392_s19, 128  ;;  %p2520_p12 = scmp.lt.s32.totalorder %s392_s19, %s392_s19 }
  0x79   : > { %p2513_p9 = scmp.ne.s32.totalorder %s392_s19, %s2512_s15  ;;  %p2521_p4 = scmp.lt.s32.totalorder %s2512_s15, %s2512_s15 }
  0x7b   : > { %p2515_p10 = pnand %p2513_p9, %p2808_p8  ;;  %p2522_p1 = por %p2521_p4, %p2520_p12 }
  0x7d   : > { %p2516_p11 = pneg %p2515_p10 }
  0x7f   : > { %p2523_p3 = pnand %p2522_p1, %p2516_p11 }
  0x81   : > { %2526 = shalt.err (!%p2523_p3)
}
  0x82   : > { %2325 = dma.hbm_to_vmem [thread:$0]  (!%p2794_p6), %s3321_s10, 128, %s392_s19, [#allocation12]  }
  0x83   : > { %s2054_s25 = sadd.s32 4294967294, %s2669_s24   ;;  %s2897_s13 = sadd.s32 1, %s2669_s24  }
  0x84   : > { %3322 = sst [smem:[#allocation21_spill]] %s2897_s13  ;;  %s37_s12 = ssub.s32 %s2669_s24, %s2897_s13 }
  0x85   : > { %s40_s18 = sadd.s32 1, %s2665_s23  ;;  %p38_p1 = scmp.eq.s32.totalorder %s37_s12, 0 }
  0x86   : > { %p47_p3 = scmp.ne.s32.totalorder %s2665_s23, %s2661_s22  ;;  %p48_p8 = scmp.eq.s32.totalorder %s2669_s24, 0 }
  0x87   : > { %p53_p13 = scmp.ne.s32.totalorder %s2661_s22, %s2657_s21  ;;  %p3325_p2 = scmp.eq.s32.totalorder %s2776_s27, 0 }
  0x88   : > { %s2908_s20 = scalar_select %p38_p1, %s2665_s23, %s40_s18  }
  0x89   : > { %p2910_p0 = por %p48_p8, %p47_p3  ;;  %p2916_p6 = por %p3325_p2, %p53_p13 }
  0x8a   : > { %3323 = sst [smem:[#allocation22_spill]] %s2908_s20  ;;  %p318_p5 = scmp.eq.s32.totalorder %s2776_s27, 1 }
  0x8b   : > { %s3326_s19 = scalar_select %p2916_p6, 1, 0 }
  0x8c   : > { %p324_p7 = scmp.eq.s32.totalorder %s2054_s25, 1  ;;  %p2341_p9 = scmp.lt.s32.totalorder %s2669_s24, 2 }
  0x8d   : > { %s405_s14 = sand.u32 1, %s2665_s23   ;;  %p2923_p10 = por %p318_p5, %p47_p3 }
  0x8e   : > { %p2927_p11 = por %p324_p7, %p53_p13  ;;  %s2931_s26 = sshll.u32 %s405_s14, 3 }
  0x8f   : > { %s3327_s16 = scalar_select %p2923_p10, 1, 0 }
  0x90   : > { %s3328_s17 = scalar_select %p2927_p11, 1, 0 }
  0x91   : > { %s2062_s30 = sshll.u32 %s2669_s24, 7  ;;  %s409_s25 = scalar_lea.vmem [#allocation2], %s2931_s26 }
  0x92   : > { %s2937_s4 = scalar_lea.hbm %s3287_s0, %s2062_s30  ;;  %s416_s12 = sshll.u32 %s409_s25, 4  ;;  %s2940_s12 = int_to_ptr.vmem [resolvable:$true] %s416_s12 }
  0x93   : > { %p2944_p12 = pnand %p2341_p9, %p2910_p0  ;;  %s2951_s15 = scalar_lea.hbm %s3288_s1, %s2062_s30 }
  0x94   : > { %s423_s11 = sand.u32 1, %s2669_s24   ;;  %s406_s10 = scalar_lea.sflag [#allocation3], %s405_s14 }
  0x95   : > { %s2527_s20 = scalar_lea.hbm %s2937_s4, 128  ;;  %p2529_p1 = pneg %p2944_p12 }
  0x96   : > { %p2528_p4 = scmp.ne.s32.totalorder %s2937_s4, %s2527_s20  ;;  %s2532_s23 = scalar_lea.hbm %s3287_s0, 256 }
  0x97   : > { %p2533_p13 = scmp.lt.u32.totalorder %s2937_s4, %s3287_s0  ;;  %p2534_p0 = scmp.lt.u32.totalorder %s2532_s23, %s2527_s20 }
  0x98   : > { %p2530_p3 = pnand %p2529_p1, %p2528_p4  ;;  %p2536_p5 = scmp.lt.u32.totalorder %s2527_s20, %s2937_s4 }
  0x99   : > { %p2535_p2 = por %p2534_p0, %p2533_p13 }
  0x9a   : > { %p2531_p8 = pneg %p2530_p3 }
  0x9b   : > { %p2537_p7 = por %p2536_p5, %p2535_p2 }
  0x9d   : > { %p2538_p9 = pnand %p2537_p7, %p2531_p8 }
  0x9f   : > { %2541 = shalt.err (!%p2538_p9)
}
  0xa0   : > { %s2542_s8 = scalar_lea.vmem %s2940_s12, 128  ;;  %s2677_s14 = smov [#allocation2]  }
  0xa1   : > { %p2543_p4 = scmp.ne.s32.totalorder %s2940_s12, %s2542_s8  ;;  %s2547_s30 = sshll.u32 %s2677_s14, 4  ;;  %s2548_s30 = int_to_ptr.vmem [resolvable:$false] %s2547_s30 }
  0xa2   : > { %s2549_s13 = scalar_lea.vmem %s2548_s30, 256  ;;  %p2550_p10 = scmp.lt.s32.totalorder %s2940_s12, %s2548_s30 }
  0xa3   : > { %p2545_p3 = pnand %p2543_p4, %p2529_p1  ;;  %p2551_p13 = scmp.lt.s32.totalorder %s2549_s13, %s2542_s8 }
  0xa5   : > { %p2546_p11 = pneg %p2545_p3  ;;  %p2552_p0 = por %p2551_p13, %p2550_p10 }
  0xa7   : > { %p2553_p2 = pnand %p2552_p0, %p2546_p11 }
  0xa9   : > { %2556 = shalt.err (!%p2553_p2)
}
  0xaa   : > { %2329 = dma.hbm_to_vmem [thread:$0]  (!%p2944_p12), %s2937_s4, 128, %s2940_s12, %s406_s10  }
  0xab   : > { %s427_s23 = scalar_lea.vmem [#allocation5], %s2931_s26  ;;  %s424_s29 = scalar_lea.sflag [#allocation6], %s423_s11 }
  0xac   : > { %s434_s20 = sshll.u32 %s427_s23, 4  ;;  %s2557_s25 = scalar_lea.hbm %s2951_s15, 128  ;;  %s435_s20 = int_to_ptr.vmem [resolvable:$true] %s434_s20 }
  0xad   : > { %p2558_p10 = scmp.ne.s32.totalorder %s2951_s15, %s2557_s25  ;;  %s2562_s14 = scalar_lea.hbm %s3288_s1, 256 }
  0xae   : > { %p2563_p5 = scmp.lt.u32.totalorder %s2951_s15, %s3288_s1  ;;  %p2564_p7 = scmp.lt.u32.totalorder %s2562_s14, %s2557_s25 }
  0xaf   : > { %p2560_p11 = pnand %p2558_p10, %p2529_p1  ;;  %p2566_p4 = scmp.lt.u32.totalorder %s2557_s25, %s2951_s15 }
  0xb0   : > { %p2565_p9 = por %p2564_p7, %p2563_p5 }
  0xb1   : > { %p2561_p8 = pneg %p2560_p11 }
  0xb2   : > { %p2567_p3 = por %p2566_p4, %p2565_p9 }
  0xb4   : > { %p2568_p13 = pnand %p2567_p3, %p2561_p8 }
  0xb6   : > { %2571 = shalt.err (!%p2568_p13)
}
  0xb7   : > { %s2572_s10 = scalar_lea.vmem %s435_s20, 128  ;;  %s2678_s26 = smov [#allocation5]  }
  0xb8   : > { %p2573_p0 = scmp.ne.s32.totalorder %s435_s20, %s2572_s10  ;;  %s2577_s4 = sshll.u32 %s2678_s26, 4  ;;  %s2578_s4 = int_to_ptr.vmem [resolvable:$false] %s2577_s4 }
  0xb9   : > { %s2579_s12 = scalar_lea.vmem %s2578_s4, 256  ;;  %p2580_p11 = scmp.lt.s32.totalorder %s435_s20, %s2578_s4 }
  0xba   : > { %p2575_p2 = pnand %p2573_p0, %p2529_p1  ;;  %p2581_p6 = scmp.lt.s32.totalorder %s2579_s12, %s2572_s10 }
  0xbc   : > { %p2576_p10 = pneg %p2575_p2  ;;  %p2582_p5 = por %p2581_p6, %p2580_p11 }
  0xbe   : > { %p2583_p7 = pnand %p2582_p5, %p2576_p10 }
  0xc0   : > { %2586 = shalt.err (!%p2583_p7)
}
  0xc1   : > { %2332 = dma.hbm_to_vmem [thread:$0]  (!%p2944_p12), %s2951_s15, 128, %s435_s20, %s424_s29  }
  0xc2   : > { %p3330_p8 = scmp.ne.s32.totalorder %s3315_s28, 0 }
  0xc3   : > { %s3004_s11 = sand.u32 (!%p3330_p8), 1, %s2661_s22   ;;  %p3331_p6 = scmp.ne.s32.totalorder (!%p3330_p8), %s3326_s19, 0 }
  0xc4   : > { %449 = sbr.rel (%p3330_p8) target bundleno = 4399 (0x112f), region = 68  ;;  %s3007_s23 = sshll.u32 (!%p3330_p8), %s3004_s11, 3 }
  0xc5   : > { %s452_s25 = scalar_lea.sflag (!%p3330_p8), [#allocation3], %s3004_s11  ;;  %s455_s7 = scalar_lea.vmem (!%p3330_p8), [#allocation2], %s3007_s23 }
  0xcb   : > { %2632 = dma.done.wait (%p3331_p6), %s452_s25, 128  }
  0xcc   : > { %2634 = vsyncadd (%p3331_p6), %s452_s25, 4294967168  ;;  %s460_s28 = sand.u32 1, %s2776_s27   ;;  %s464_s15 = scalar_lea.vmem [#allocation5], %s3007_s23 }
  0xcd   : > { %s461_s18 = scalar_lea.sflag [#allocation6], %s460_s28 }
  0xce   : > { %2636 = dma.done.wait (%p3331_p6), %s461_s18, 128  }
  0xcf   : > { %2638 = vsyncadd (%p3331_p6), %s461_s18, 4294967168  ;;  %p3332_p12 = scmp.eq.s32.totalorder %s2776_s27, 0 }
  0xd1   : > { %2640 = dma.done.wait (%p3332_p12), [#allocation6], 16   ;;  %p3333_p1 = pmov %p3332_p12 }
  0xd3   : > { %2642 = vsyncadd (%p3333_p1), [#allocation6], 4294967280  ;;  %p3334_p9 = pmov %p3333_p1 }
  0xd4   : > { %p3335_p4 = pmov %p3333_p1 }
  0xd5   : > { %2644 = dma.done.wait (%p3334_p9), [#allocation9], 528  }
  0xd6   : > { %2646 = vsyncadd (%p3335_p4), [#allocation9], 4294966768  ;;  %p3336_p3 = pmov %p3333_p1 }
  0xd7   : > { %p3337_p13 = pmov %p3333_p1 }
  0xd8   : > { %2648 = dma.done.wait (%p3336_p3), [#allocation12], 128  }
  0xd9   : > { %2650 = vsyncadd (%p3337_p13), [#allocation12], 4294967168  ;;  %v2679_v0 = vmov 0.0|0.0   ;;  %vm2680_vm0 = vmmov 0   ;;  %v2681_v1 = vmov 0.0   ;;  %v543_v2 = vld [vmem:[%s3290_s3] sm:$0xff]  ;;  %v632_v32 = vlaneseq }
  0xda   : > { %2261 = vmatprep.subr.bf16.mxu0 %v2679_v0  ;;  %2157 = vmatprep.mubr.msk.f32.mxu0 %vm2680_vm0, %v2681_v1  ;;  %v544_v3 = vld [vmem:[%s3290_s3 + $0x8] sm:$0xff]  ;;  %v545_v4 = vld [vmem:[%s3290_s3 + $0x10] sm:$0xff]  ;;  %v546_v6 = vld [vmem:[%s3290_s3 + $0x18] sm:$0xff]  ;;  %vm554_vm1 = vcmask 261120   ;;  %s2682_s26 = smov 88   ;;  %s2683_s4 = smov 96  }
  0xdb   : > { %2267 = vmatprep.subr.bf16.mxu1 %v2679_v0  ;;  %2168 = vmatprep.mubr.msk.f32.mxu1 %vm2680_vm0, %v2681_v1  ;;  %v2262_v5 = vpack.c.bf16 %v544_v3, %v543_v2  ;;  %v2265_v7 = vpack.c.bf16 %v546_v6, %v545_v4  ;;  %v3051_v8 = vld [vmem:[%s455_s7] sm:$0xff]  ;;  %v533_v9 = vld [vmem:[%s464_s15] sm:$0xff]  ;;  %vm716_vm2 = vcmask 64512   ;;  %p529_p0 = scmp.lt.s32.totalorder %s2776_s27, 1  ;;  %v3097_v33 = vshrl.u32 %v632_v32, 7  ;;  %s2684_s13 = smov 120  }
  0xdc   : > { %v534_v10 = vadd.f32 %v533_v9, %v3051_v8  ;;  %v2074_v11 = vld [vmem:[#allocation7] ss:$0 sm:$0xff]  ;;  %v629_v17 = vld [vmem:[%s3292_s5 + $0x8] sm:$0xff]  ;;  %v630_v18 = vld [vmem:[%s3292_s5 + $0x10] sm:$0xff]  ;;  %s2685_s10 = smov 112   ;;  %s2687_s28 = smov 104  }
  0xdd   : > { %2263 = vmatpush3.bf16.msra.mxu0 %v2262_v5  ;;  %v628_v16 = vld [vmem:[%s3292_s5] sm:$0xff]  ;;  %v631_v20 = vld [vmem:[%s3292_s5 + $0x18] sm:$0xff]  ;;  %s530_s29 = scalar_select %p529_p0, %s2776_s27, 1  ;;  %v634_v34 = vsub.s32 0, %v3097_v33  ;;  %v710_v56 = vld [vmem:[%s3293_s6 + $0x8] sm:$0xff]  ;;  %vm1801_vm4 = vcmask 523264  }
  0xde   : > { %2264 = vmatprep.subr.bf16.mxu0 %v2679_v0  ;;  %v2268_v19 = vpack.c.bf16 %v629_v17, %v628_v16  ;;  %v2271_v21 = vpack.c.bf16 %v631_v20, %v630_v18  ;;  %v3100_v35 = vld [vmem:[#allocation11] sm:$0x7f]  ;;  %s2688_s18 = smov 72   ;;  %s3339_s25 = sld [smem:[#allocation28_spill]] }
  0xdf   : > { %s531_s30 = scalar_lea.vmem %s3289_s2, %s530_s29  ;;  %v635_v36 = vrot.slane %v3100_v35, %v634_v34  ;;  %v709_v61 = vld [vmem:[%s3293_s6] sm:$0xff]  ;;  %p3340_p10 = scmp.ne.s32.totalorder %s3327_s16, 0 }
  0xe0   : > { %2269 = vmatpush3.bf16.msra.mxu1 %v2268_v19  ;;  %v3092_v22 = vld [vmem:[%s531_s30] ss:$0 sm:$0xff]  ;;  %s3338_s30 = sld [smem:[#allocation27_spill]] }
  0xe1   : > { %2266 = vmatpush3.bf16.msra.mxu0 %v2265_v7  ;;  %2270 = vmatprep.subr.bf16.mxu1 %v2679_v0 }
  0xe2   : > { %2171 = vmatprep.subr.mxu0 %v2681_v1 }
  0xe4   : > { %2158 = vmatmul.mubr.msk.f32.vlgmr.msra.gmra.mrb[0].mxu0 %vm554_vm1, %v534_v10  ;;  %2272 = vmatpush3.bf16.msra.mxu1 %v2271_v21 }
  0xe5   : > { %2173 = vmatprep.mubr.msk.f32.mxu0 %vm2680_vm0, %v2681_v1  ;;  %2186 = vmatprep.subr.mxu1 %v2681_v1 }
  0xe7   : > { %2169 = vmatmul.mubr.msk.f32.vlgmr.msra.gmra.mrb[0].mxu1 %vm554_vm1, %v3051_v8 }
  0xe8   : > { %2188 = vmatprep.mubr.msk.f32.mxu1 %vm2680_vm0, %v2681_v1 }
 0x1b7   : > { %v624_v12 = vpop.f32.mrb[0].mxu0 }
 0x1b8   : > { %v3059_v13 = vadd.f32 %v2074_v11, %v624_v12  ;;  %v2159_v14 = vpop.f32.mrb[1].mxu0 }
 0x1ba   : > { %877 = vrot.lane.b32.xlu1 %v3059_v13, %s2682_s26  ;;  %714 = vrot.lane.b32.xlu0 %v3059_v13, %s2683_s4  ;;  %v705_v37 = vpop.f32.mrb[0].mxu1  ;;  %s2686_s26 = smov 80  }
 0x1bb   : > { %v3105_v38 = vadd.f32 %v705_v37, %v635_v36  ;;  %v2170_v39 = vpop.f32.mrb[1].mxu1 }
 0x22c   : > { %v715_v15 = vpop.permute.xlu0 %714  ;;  %v878_v40 = vpop.permute.xlu1 %877 }
 0x22d   : > { %2172 = vmatpush3.xpose.msk.msra.mxu0 %vm716_vm2, %v715_v15 }
 0x22e   : > { %2176 = vmatprep.subr.mxu0 %v2681_v1 }
 0x230   : > { %2174 = vmatmul.mubr.msk.f32.vlgmr.msra.gmra.mrb[2].mxu0 %vm716_vm2, %v3059_v13 }
 0x231   : > { %2178 = vmatprep.mubr.msk.f32.mxu0 %vm2680_vm0, %v2681_v1  ;;  %2177 = vmatpush3.msra.mxu0 %v3105_v38 }
 0x232   : > { %2181 = vmatprep.subr.mxu0 %v2681_v1 }
 0x303   : > { %v787_v23 = vpop.f32.mrb[2].mxu0 }
 0x304   : > { %v788_v24 = vadd.f32 %v3092_v22, %v787_v23  ;;  %v2175_v25 = vpop.f32.mrb[3].mxu0 }
 0x306   : > { %v791_v26 = vsel %vm716_vm2, %v788_v24, -inf }
 0x307   : > { %792 = vmax.xlane.f32.xlu0 %v791_v26 }
 0x394   : > { %v793_v27 = vpop.xlane.xlu0 %792 }
 0x395   : > { %v794_v28 = vsub.f32 %v788_v24, %v793_v27 }
 0x397   : > { %v795_v29 = vmul.f32 1.442695, %v794_v28 }
 0x399   : > { %2395 = vpow2.f32 %v795_v29 }
 0x3a3   : > { %v2396_v30 = vpop.eup %2395 }
 0x3a4   : > { %v797_v31 = vsel %vm716_vm2, %v2396_v30, 0.0 }
 0x3a5   : > { %798 = vadd.xlane.f32.xlu1 %v797_v31 }
 0x3b6   : > { %875 = vrot.lane.b32.xlu1 %v3059_v13, %s2684_s13 }
 0x432   : > { %v799_v41 = vpop.xlane.xlu1 %798 }
 0x433   : > { %2397 = vrcp.f32 %v799_v41 }
 0x436   : > { %v876_v44 = vpop.permute.xlu1 %875 }
 0x43d   : > { %v2398_v42 = vpop.eup %2397 }
 0x43e   : > { %v801_v43 = vmul.f32 %v2398_v42, %v2396_v30 }
 0x440   : > { %2179 = vmatmul.mubr.msk.f32.vlgmr.msra.gmra.mrb[4].mxu0 %vm716_vm2, %v801_v43 }
 0x441   : > { %2182 = vmatpush3.xpose.msk.msra.mxu0 %vm716_vm2, %v878_v40  ;;  %2183 = vmatprep.mubr.msk.f32.mxu0 %vm2680_vm0, %v2681_v1 }
 0x442   : > { %2191 = vmatprep.subr.mxu0 %v2681_v1 }
 0x444   : > { %2184 = vmatmul.mubr.msk.f32.vlgmr.msra.gmra.mrb[6].mxu0 %vm716_vm2, %v876_v44 }
 0x445   : > { %2193 = vmatprep.mubr.msk.f32.mxu0 %vm2680_vm0, %v2681_v1  ;;  %2192 = vmatpush3.msra.mxu0 %v710_v56 }
 0x446   : > { %2201 = vmatprep.subr.mxu0 %v2681_v1 }
 0x513   : > { %v871_v45 = vpop.f32.mrb[4].mxu0 }
 0x514   : > { %v2180_v46 = vpop.f32.mrb[5].mxu0 }
 0x517   : > { %v949_v47 = vpop.f32.mrb[6].mxu0 }
 0x518   : > { %v950_v48 = vadd.f32 %v3092_v22, %v949_v47  ;;  %v2185_v49 = vpop.f32.mrb[7].mxu0 }
 0x519   : > { %v1667_v49 = vsub.s32 1, %v3097_v33 }
 0x51a   : > { %v953_v50 = vsel %vm716_vm2, %v950_v48, -inf }
 0x51b   : > { %954 = vmax.xlane.f32.xlu1 %v953_v50  ;;  %v1668_v50 = vrot.slane %v3100_v35, %v1667_v49 }
 0x52c   : > { %1187 = vrot.lane.b32.xlu1 %v3059_v13, %s2685_s10 }
 0x5a8   : > { %v955_v51 = vpop.xlane.xlu1 %954 }
 0x5a9   : > { %v956_v52 = vsub.f32 %v950_v48, %v955_v51 }
 0x5ab   : > { %v957_v53 = vmul.f32 1.442695, %v956_v52 }
 0x5ac   : > { %v1188_v3 = vpop.permute.xlu1 %1187 }
 0x5ad   : > { %2399 = vpow2.f32 %v957_v53 }
 0x5b7   : > { %v2400_v54 = vpop.eup %2399 }
 0x5b8   : > { %v959_v55 = vsel %vm716_vm2, %v2400_v54, 0.0 }
 0x5b9   : > { %960 = vadd.xlane.f32.xlu0 %v959_v55 }
 0x5cf   : > { %965 = vrot.lane.b32.xlu0 %v3105_v38, %s2684_s13  ;;  %s2098_s13 = sshll.u32 %s2776_s27, 7  ;;  %s2689_s27 = smov [#allocation13]  }
 0x5d0   : > { %s3242_s7 = scalar_lea.hbm %s3339_s25, %s2098_s13 }
 0x5d3   : > { %1189 = vrot.lane.b32.xlu0 %v3059_v13, %s2686_s26 }
 0x646   : > { %v961_v57 = vpop.xlane.xlu0 %960 }
 0x647   : > { %2401 = vrcp.f32 %v961_v57 }
 0x64a   : > { %v966_v58 = vpop.permute.xlu0 %965 }
 0x64b   : > { %2187 = vmatpush3.msra.mxu1 %v966_v58 }
 0x64c   : > { %2196 = vmatprep.subr.mxu1 %v2681_v1 }
 0x64e   : > { %v1190_v63 = vpop.permute.xlu0 %1189 }
 0x651   : > { %v2402_v59 = vpop.eup %2401 }
 0x652   : > { %v963_v60 = vmul.f32 %v2402_v59, %v2400_v54 }
 0x654   : > { %2189 = vmatmul.mubr.msk.f32.vlgmr.msra.gmra.mrb[2].mxu1 %vm716_vm2, %v963_v60 }
 0x655   : > { %2197 = vmatpush3.msra.mxu1 %v709_v61  ;;  %2198 = vmatprep.mubr.msk.f32.mxu1 %vm2680_vm0, %v2681_v1 }
 0x656   : > { %2206 = vmatprep.subr.mxu1 %v2681_v1 }
 0x658   : > { %2199 = vmatmul.mubr.msk.f32.vlgmr.msra.gmra.mrb[4].mxu1 %vm716_vm2, %v871_v45 }
 0x659   : > { %2208 = vmatprep.mubr.msk.f32.mxu1 %vm2680_vm0, %v2681_v1 }
 0x727   : > { %v1037_v62 = vpop.f32.mrb[2].mxu1 }
 0x728   : > { %v2190_v2 = vpop.f32.mrb[3].mxu1  ;;  %2194 = vmatmul.mubr.msk.f32.vlgmr.msra.gmra.mrb[8].mxu0 %vm716_vm2, %v1037_v62  ;;  %v1696_v62 = vld [vmem:[#allocation8 + $0x8] sm:$0xff] }
 0x729   : > { %2202 = vmatpush3.xpose.msk.msra.mxu0 %vm716_vm2, %v1190_v63  ;;  %2203 = vmatprep.mubr.msk.f32.mxu0 %vm2680_vm0, %v2681_v1  ;;  %v1697_v2 = vld [vmem:[#allocation8 + $0x10] sm:$0xff] }
 0x72a   : > { %2211 = vmatprep.subr.mxu0 %v2681_v1 }
 0x72b   : > { %v1183_v4 = vpop.f32.mrb[4].mxu1 }
 0x72c   : > { %v2200_v5 = vpop.f32.mrb[5].mxu1  ;;  %2204 = vmatmul.mubr.msk.f32.vlgmr.msra.gmra.mrb[10].mxu0 %vm716_vm2, %v1188_v3  ;;  %v1698_v3 = vld [vmem:[#allocation8 + $0x18] sm:$0xff] }
 0x72d   : > { %2213 = vmatprep.mubr.msk.f32.mxu0 %vm2680_vm0, %v2681_v1  ;;  %v1790_v5 = vld [vmem:[%s3296_s9 + $0x8] sm:$0xff] }
 0x7fb   : > { %v1110_v6 = vpop.f32.mrb[8].mxu0 }
 0x7fc   : > { %v1184_v7 = vadd.f32 %v1183_v4, %v1110_v6  ;;  %v2195_v9 = vpop.f32.mrb[9].mxu0  ;;  %v2277_v4 = vpack.c.bf16 %v1698_v3, %v1697_v2  ;;  %v1791_v6 = vld [vmem:[%s3296_s9 + $0x10] sm:$0xff] }
 0x7fd   : > { %v1792_v9 = vld [vmem:[%s3296_s9 + $0x18] sm:$0xff] }
 0x7ff   : > { %v1261_v10 = vpop.f32.mrb[10].mxu0 }
 0x800   : > { %v1262_v11 = vadd.f32 %v3092_v22, %v1261_v10  ;;  %v2205_v12 = vpop.f32.mrb[11].mxu0  ;;  %v2283_v10 = vpack.c.bf16 %v1792_v9, %v1791_v6 }
 0x801   : > { %v1794_v12 = vld [vmem:[%s3296_s9 + $0x28] sm:$0xff] }
 0x802   : > { %v1265_v14 = vsel %vm716_vm2, %v1262_v11, -inf }
 0x803   : > { %1266 = vmax.xlane.f32.xlu0 %v1265_v14 }
 0x819   : > { %1276 = vrot.lane.b32.xlu0 %v3105_v38, %s2685_s10  ;;  %s528_s10 = scalar_lea.vmem [#allocation13], %s3007_s23  ;;  %s2591_s23 = sshll.u32 %s2689_s27, 4  ;;  %s2592_s23 = int_to_ptr.vmem [resolvable:$false] %s2591_s23 }
 0x81a   : > { %s1914_s26 = sshll.u32 %s528_s10, 4  ;;  %s2593_s15 = scalar_lea.vmem %s2592_s23, 256  ;;  %s3244_s26 = int_to_ptr.vmem [resolvable:$true] %s1914_s26 }
 0x81b   : > { %p2594_p7 = scmp.lt.s32.totalorder %s3244_s26, %s2592_s23 }
 0x81d   : > { %1426 = vrot.lane.b32.xlu0 %v3059_v13, %s2687_s28 }
 0x890   : > { %v1267_v15 = vpop.xlane.xlu0 %1266 }
 0x891   : > { %v1268_v16 = vsub.f32 %v1262_v11, %v1267_v15  ;;  %v1793_v11 = vld [vmem:[%s3296_s9 + $0x20] sm:$0xff] }
 0x892   : > { %v2286_v14 = vpack.c.bf16 %v1794_v12, %v1793_v11 }
 0x893   : > { %v1269_v17 = vmul.f32 1.442695, %v1268_v16 }
 0x894   : > { %v1277_v18 = vpop.permute.xlu0 %1276 }
 0x895   : > { %2403 = vpow2.f32 %v1269_v17  ;;  %2207 = vmatpush3.msra.mxu1 %v1277_v18  ;;  %v1687_v18 = vsub.s32 3, %v3097_v33 }
 0x896   : > { %2216 = vmatprep.subr.mxu1 %v2681_v1 }
 0x898   : > { %v1427_v26 = vpop.permute.xlu0 %1426 }
 0x89f   : > { %v2404_v19 = vpop.eup %2403 }
 0x8a0   : > { %v1271_v20 = vsel %vm716_vm2, %v2404_v19, 0.0 }
 0x8a1   : > { %1272 = vadd.xlane.f32.xlu1 %v1271_v20  ;;  %v1688_v20 = vrot.slane %v3100_v35, %v1687_v18 }
 0x8b2   : > { %1428 = vrot.lane.b32.xlu1 %v3059_v13, %s2688_s18  ;;  %v711_v13 = vld [vmem:[%s3293_s6 + $0x10] sm:$0xff]  ;;  %s2587_s18 = scalar_lea.vmem %s3244_s26, 128 }
 0x8b3   : > { %2212 = vmatpush3.msra.mxu0 %v711_v13  ;;  %v1796_v13 = vld [vmem:[%s3296_s9 + $0x38] sm:$0xff]  ;;  %p2588_p2 = scmp.ne.s32.totalorder %s3244_s26, %s2587_s18  ;;  %p2595_p8 = scmp.lt.s32.totalorder %s2593_s15, %s2587_s18 }
 0x8b4   : > { %2221 = vmatprep.subr.mxu0 %v2681_v1 }
 0x8b5   : > { %p2589_p11 = pnand %p2588_p2, %p3340_p10  ;;  %p2596_p6 = por %p2595_p8, %p2594_p7 }
 0x8b7   : > { %p2590_p5 = pneg %p2589_p11 }
 0x8b9   : > { %p2597_p12 = pnand %p2596_p6, %p2590_p5 }
 0x92e   : > { %v1273_v21 = vpop.xlane.xlu1 %1272 }
 0x92f   : > { %2405 = vrcp.f32 %v1273_v21 }
 0x932   : > { %v1429_v25 = vpop.permute.xlu1 %1428 }
 0x939   : > { %v2406_v23 = vpop.eup %2405 }
 0x93a   : > { %v1275_v24 = vmul.f32 %v2406_v23, %v2404_v19  ;;  %v1692_v19 = vsub.s32 4, %v3097_v33 }
 0x93c   : > { %2209 = vmatmul.mubr.msk.f32.vlgmr.msra.gmra.mrb[6].mxu1 %vm716_vm2, %v1275_v24  ;;  %v1693_v24 = vrot.slane %v3100_v35, %v1692_v19 }
 0x93d   : > { %2217 = vmatpush3.xpose.msk.msra.mxu1 %vm716_vm2, %v1429_v25  ;;  %2218 = vmatprep.mubr.msk.f32.mxu1 %vm2680_vm0, %v2681_v1 }
 0x93e   : > { %2226 = vmatprep.subr.mxu1 %v2681_v1 }
 0x940   : > { %2219 = vmatmul.mubr.msk.f32.vlgmr.msra.gmra.mrb[8].mxu1 %vm716_vm2, %v1427_v26 }
 0x941   : > { %2228 = vmatprep.mubr.msk.f32.mxu1 %vm2680_vm0, %v2681_v1 }
 0xa0f   : > { %v1348_v27 = vpop.f32.mrb[6].mxu1 }
 0xa10   : > { %v2210_v28 = vpop.f32.mrb[7].mxu1  ;;  %2214 = vmatmul.mubr.msk.f32.vlgmr.msra.gmra.mrb[12].mxu0 %vm716_vm2, %v1348_v27 }
 0xa11   : > { %2223 = vmatprep.mubr.msk.f32.mxu0 %vm2680_vm0, %v2681_v1  ;;  %v2093_v28 = vld [vmem:[#allocation10] ss:$0 sm:$0xff] }
 0xa13   : > { %v1500_v29 = vpop.f32.mrb[8].mxu1 }
 0xa14   : > { %v1501_v30 = vadd.f32 %v3092_v22, %v1500_v29  ;;  %v2220_v31 = vpop.f32.mrb[9].mxu1  ;;  %v712_v22 = vld [vmem:[%s3293_s6 + $0x18] sm:$0xff] }
 0xa15   : > { %2227 = vmatpush3.msra.mxu1 %v712_v22 }
 0xa16   : > { %v1504_v32 = vsel %vm716_vm2, %v1501_v30, -inf  ;;  %2279 = vmatprep.subr.bf16.mxu1 %v2679_v0 }
 0xa17   : > { %1505 = vmax.xlane.f32.xlu0 %v1504_v32 }
 0xa2d   : > { %1515 = vrot.lane.b32.xlu0 %v3105_v38, %s2687_s28  ;;  %s1901_s28 = scalar_lea.sflag [#allocation4], %s3004_s11 }
 0xaa4   : > { %v1506_v34 = vpop.xlane.xlu0 %1505 }
 0xaa5   : > { %v1507_v36 = vsub.f32 %v1501_v30, %v1506_v34  ;;  %v2095_v30 = vld [vmem:[%s3338_s30] ss:$0 sm:$0xff] }
 0xaa7   : > { %v1508_v37 = vmul.f32 1.442695, %v1507_v36 }
 0xaa8   : > { %v1516_v39 = vpop.permute.xlu0 %1515 }
 0xaa9   : > { %2407 = vpow2.f32 %v1508_v37  ;;  %2222 = vmatpush3.msra.mxu0 %v1516_v39  ;;  %v1799_v37 = vsub.s32 2, %v3097_v33 }
 0xaaa   : > { %2273 = vmatprep.subr.bf16.mxu0 %v2679_v0 }
 0xaab   : > { %v1800_v39 = vrot.slane %v3100_v35, %v1799_v37 }
 0xab3   : > { %v2408_v40 = vpop.eup %2407 }
 0xab4   : > { %v1510_v41 = vsel %vm716_vm2, %v2408_v40, 0.0 }
 0xab5   : > { %1511 = vadd.xlane.f32.xlu1 %v1510_v41 }
 0xae3   : > { %v1421_v38 = vpop.f32.mrb[12].mxu0 }
 0xae4   : > { %v1425_v42 = vadd.f32 %v1421_v38, %v1184_v7  ;;  %v2215_v43 = vpop.f32.mrb[13].mxu0 }
 0xb42   : > { %v1512_v44 = vpop.xlane.xlu1 %1511 }
 0xb43   : > { %2409 = vrcp.f32 %v1512_v44 }
 0xb4d   : > { %v2410_v45 = vpop.eup %2409 }
 0xb4e   : > { %v1514_v46 = vmul.f32 %v2410_v45, %v2408_v40 }
 0xb50   : > { %2224 = vmatmul.mubr.msk.f32.vlgmr.msra.gmra.mrb[14].mxu0 %vm716_vm2, %v1514_v46 }
 0xb51   : > { %2239 = vmatprep.mubr.msk.f32.mxu0 %vm2680_vm0, %v2681_v1 }
 0xc23   : > { %v1587_v47 = vpop.f32.mrb[14].mxu0 }
 0xc24   : > { %v2225_v48 = vpop.f32.mrb[15].mxu0  ;;  %2229 = vmatmul.mubr.msk.f32.vlgmr.msra.gmra.mrb[10].mxu1 %vm716_vm2, %v1587_v47 }
 0xc25   : > { %2258 = vmatprep.mubr.msk.f32.mxu1 %vm2680_vm0, %v2681_v1  ;;  %v1695_v1 = vld [vmem:[#allocation8] sm:$0xff] }
 0xc26   : > { %v2274_v63 = vpack.c.bf16 %v1696_v62, %v1695_v1 }
 0xc28   : > { %2275 = vmatpush3.bf16.msra.mxu0 %v2274_v63 }
 0xc29   : > { %2276 = vmatprep.subr.bf16.mxu0 %v2679_v0 }
 0xc2c   : > { %2278 = vmatpush3.bf16.msra.mxu0 %v2277_v4 }
 0xcf7   : > { %v1660_v51 = vpop.f32.mrb[10].mxu1 }
 0xcf8   : > { %v1664_v52 = vadd.f32 %v1660_v51, %v1425_v42  ;;  %v2230_v53 = vpop.f32.mrb[11].mxu1  ;;  %v1891_v51 = vsub.s32 5, %v3097_v33 }
 0xcfa   : > { %v1669_v54 = vadd.f32 %v1668_v50, %v1664_v52  ;;  %v1896_v52 = vsub.s32 6, %v3097_v33  ;;  %v1892_v53 = vrot.slane %v3100_v35, %v1891_v51 }
 0xcfc   : > { %v1670_v55 = vadd.f32 %v1669_v54, %v3051_v8  ;;  %v1789_v8 = vld [vmem:[%s3296_s9] sm:$0xff] }
 0xcfd   : > { %v2280_v7 = vpack.c.bf16 %v1790_v5, %v1789_v8 }
 0xcfe   : > { %v1671_v56 = vsel %vm554_vm1, %v1670_v55, 0.0 }
 0xcff   : > { %1672 = vadd.xlane.f32.xlu1 %v1671_v56  ;;  %2281 = vmatpush3.bf16.msra.mxu1 %v2280_v7  ;;  %v1897_v56 = vrot.slane %v3100_v35, %v1896_v52 }
 0xd00   : > { %2282 = vmatprep.subr.bf16.mxu1 %v2679_v0 }
 0xd03   : > { %2284 = vmatpush3.bf16.msra.mxu1 %v2283_v10 }
 0xd04   : > { %2285 = vmatprep.subr.bf16.mxu1 %v2679_v0 }
 0xd07   : > { %2287 = vmatpush3.bf16.msra.mxu1 %v2286_v14 }
 0xd08   : > { %2288 = vmatprep.subr.bf16.mxu1 %v2679_v0  ;;  %v1795_v0 = vld [vmem:[%s3296_s9 + $0x30] sm:$0xff] }
 0xd09   : > { %v2289_v27 = vpack.c.bf16 %v1796_v13, %v1795_v0 }
 0xd0b   : > { %2290 = vmatpush3.bf16.msra.mxu1 %v2289_v27 }
 0xd8c   : > { %v1673_v57 = vpop.xlane.xlu1 %1672 }
 0xd8d   : > { %v1675_v58 = vmul.f32 0.03125, %v1673_v57 }
 0xd8f   : > { %v1676_v59 = vsub.f32 %v1670_v55, %v1675_v58 }
 0xd91   : > { %v1677_v60 = vmul.f32 %v1676_v59, %v1676_v59 }
 0xd93   : > { %v1678_v61 = vsel %vm554_vm1, %v1677_v60, 0.0 }
 0xd94   : > { %1679 = vadd.xlane.f32.xlu1 %v1678_v61 }
 0xe21   : > { %v1680_v15 = vpop.xlane.xlu1 %1679 }
 0xe22   : > { %v1681_v16 = vmul.f32 0.03125, %v1680_v15 }
 0xe24   : > { %v1682_v17 = vadd.f32 1e-05, %v1681_v16 }
 0xe26   : > { %2411 = vrsqrt.f32 %v1682_v17 }
 0xe30   : > { %v2412_v21 = vpop.eup %2411 }
 0xe31   : > { %v1684_v23 = vmul.f32 %v2412_v21, %v1676_v59 }
 0xe33   : > { %v1689_v25 = vmul.f32 %v1688_v20, %v1684_v23 }
 0xe35   : > { %v1694_v26 = vadd.f32 %v1693_v24, %v1689_v25 }
 0xe37   : > { %2240 = vmatmul.mubr.msk.f32.vlgmr.msra.gmra.mrb[16].mxu0 %vm554_vm1, %v1694_v26 }
 0xf0a   : > { %v1775_v29 = vpop.f32.mrb[16].mxu0 }
 0xf0b   : > { %v1776_v31 = vadd.f32 %v2093_v28, %v1775_v29  ;;  %v2241_v32 = vpop.f32.mrb[17].mxu0 }
 0xf0d   : > { %vm1779_vm3 = vcmp.gt.f32.partialorder %v1776_v31, 0.0  ;;  %v1787_v34 = vmul.f32 %v2095_v30, %v1776_v31 }
 0xf0f   : > { %v1788_v36 = vsel %vm1779_vm3, %v1776_v31, %v1787_v34 }
 0xf10   : > { %2259 = vmatmul.mubr.msk.f32.vlgmr.msra.gmra.mrb[12].mxu1 %vm1801_vm4, %v1788_v36 }
 0xfe3   : > { %v1871_v40 = vpop.f32.mrb[12].mxu1 }
 0xfe4   : > { %v1872_v41 = vadd.f32 %v1871_v40, %v1800_v39  ;;  %v2260_v22 = vpop.f32.mrb[13].mxu1 }
 0xfe6   : > { %v1875_v38 = vadd.f32 %v1872_v41, %v1694_v26 }
 0xfe8   : > { %v1876_v42 = vsel %vm554_vm1, %v1875_v38, 0.0 }
 0xfe9   : > { %1877 = vadd.xlane.f32.xlu0 %v1876_v42 }
0x1076   : > { %v1878_v43 = vpop.xlane.xlu0 %1877 }
0x1077   : > { %v1879_v44 = vmul.f32 0.03125, %v1878_v43 }
0x1079   : > { %v1880_v45 = vsub.f32 %v1875_v38, %v1879_v44 }
0x107b   : > { %v1881_v46 = vmul.f32 %v1880_v45, %v1880_v45 }
0x107d   : > { %v1882_v47 = vsel %vm554_vm1, %v1881_v46, 0.0 }
0x107e   : > { %1883 = vadd.xlane.f32.xlu1 %v1882_v47 }
0x110b   : > { %v1884_v48 = vpop.xlane.xlu1 %1883 }
0x110c   : > { %v1885_v49 = vmul.f32 0.03125, %v1884_v48 }
0x110e   : > { %v1886_v50 = vadd.f32 1e-05, %v1885_v49 }
0x1110   : > { %2413 = vrsqrt.f32 %v1886_v50 }
0x111a   : > { %v2414_v54 = vpop.eup %2413 }
0x111b   : > { %v1888_v55 = vmul.f32 %v2414_v54, %v1880_v45 }
0x111d   : > { %v1893_v57 = vmul.f32 %v1892_v53, %v1888_v55 }
0x111f   : > { %v1898_v58 = vadd.f32 %v1897_v56, %v1893_v57 }
0x1121   : > { %1899 = vst.msk [vmem:[%s528_s10] sm:$0xff] %vm554_vm1, %v1898_v58 }
0x1122   : > { %2600 = shalt.err (!%p2597_p12)
}
0x1123   : > { %s2601_s11 = scalar_lea.hbm %s3242_s7, 128  ;;  %s2605_s29 = scalar_lea.hbm %s3339_s25, 256 }
0x1124   : > { %p2602_p1 = scmp.ne.s32.totalorder %s3242_s7, %s2601_s11  ;;  %p2606_p3 = scmp.lt.u32.totalorder %s3242_s7, %s3339_s25 }
0x1125   : > { %p2607_p13 = scmp.lt.u32.totalorder %s2605_s29, %s2601_s11  ;;  %p2609_p2 = scmp.lt.u32.totalorder %s2601_s11, %s3242_s7 }
0x1126   : > { %p2603_p9 = pnand %p2602_p1, %p3340_p10 }
0x1127   : > { %p2608_p0 = por %p2607_p13, %p2606_p3 }
0x1128   : > { %p2604_p4 = pneg %p2603_p9 }
0x1129   : > { %p2610_p11 = por %p2609_p2, %p2608_p0 }
0x112b   : > { %p2611_p5 = pnand %p2610_p11, %p2604_p4 }
0x112d   : > { %2614 = shalt.err (!%p2611_p5)
}
0x112e   : > { %2311 = dma.vmem_to_hbm [thread:$0]  (%p3340_p10), %s3244_s26, 128, %s3242_s7, %s1901_s28  }
0x112f PF: > { %s1926_s30 = sand.u32 1, %s2657_s21   ;;  %p3341_p7 = scmp.ne.s32.totalorder %s3328_s17, 0 }
0x1130   : > { %p3342_p8 = scmp.ge.s32.totalorder %s2669_s24, 2  ;;  %s1927_s13 = scalar_lea.sflag [#allocation4], %s1926_s30 }
0x1132   : > { %p2334_p6 = pnand %p3342_p8, %p3341_p7 }
0x1134   : > { %2652 = dma.done.wait (!%p2334_p6), %s1927_s13, 128  }
0x1135   : > { %2654 = vsyncadd (!%p2334_p6), %s1927_s13, 4294967168  ;;  %s3343_s24 = sld [smem:[#allocation21_spill]]  ;;  %s3344_s10 = sld [smem:[#allocation20_spill]] }
0x1136   : > { %s3345_s23 = sld [smem:[#allocation22_spill]]  ;;  %s3346_s21 = smov %s2661_s22 }
0x113b   : > { %p30_p12 = scmp.ge.s32.totalorder %s3343_s24, 4   ;;  %s3347_s22 = smov %s3344_s10 }
0x113d   :  { %32 = sbr.rel (!%p30_p12) target bundleno = 16 (0x10), region = 145 }
0x1144   :  { %1932 = vsyncpa [#allocation3], 1 }
0x1145   :  { %1934 = vsyncpa [#allocation3 + $0x1], 1 }
0x1146   :  { %1935 = vsyncpa [#allocation6], 1 }
0x1147   :  { %1937 = vsyncpa [#allocation6 + $0x1], 1 }
0x1148   :  { %1938 = vsyncpa [#allocation9], 1 }
0x1149   :  { %1939 = vsyncpa [#allocation12], 1 }
0x114a   :  { %1940 = vsyncpa [#allocation4], 1 }
0x114b   :  { %1942 = vsyncpa [#allocation4 + $0x1], 1 }

</bundles_post_ra>
